<compile_context>
chip_gen: v6e
topology: v6e:2x2x1
jax: 0.10.0
libtpu: 0.0.40
codegen_flags: <defaults>
</compile_context>

<pallas_src>
import math
from functools import partial

import jax
import jax.numpy as jnp
from jax.experimental import pallas as pl
from jax.experimental.pallas import tpu as pltpu


# ----------------------------- in-kernel helpers -----------------------------

def _layernorm(x, gamma, beta, eps=1e-5):
    mean = jnp.mean(x, axis=-1, keepdims=True)
    var = jnp.mean((x - mean) ** 2, axis=-1, keepdims=True)
    return (x - mean) * jax.lax.rsqrt(var + eps) * gamma + beta


def _gelu_exact(x):
    # PyTorch nn.GELU() default is the exact erf formulation.
    return 0.5 * x * (1.0 + jax.lax.erf(x * (1.0 / math.sqrt(2.0))))


# --------------------------------- kernel ------------------------------------

def fused_encoder_kernel(x0_ref, mask_ref,
                         wqkv_ref, bqkv_ref, wo_ref, bo_ref,
                         ln1w_ref, ln1b_ref,
                         w1_ref, b1_ref, w2_ref, b2_ref,
                         ln2w_ref, ln2b_ref, finw_ref, finb_ref,
                         o_ref, *, num_heads):
    layer = pl.program_id(1)
    last = pl.num_programs(1) - 1
    bf16 = jnp.bfloat16

    # First layer for this batch block: seed the resident activation buffer with
    # (sqrt(D)*embeddings + positional encoding), precomputed in the wrapper.
    @pl.when(layer == 0)
    def _init():
        o_ref[...] = x0_ref[...]

    x = o_ref[...]                                   # (NB, S, D) f32, resident
    NB, S, D = x.shape
    H = num_heads
    Dh = D // H

    # ---- fused QKV projection: one (NB*S, D) @ (D, 3D) MXU stream ----
    # (1/sqrt(Dh) already folded into the Q columns of wqkv/bqkv at pack time.)
    x2d = x.reshape(NB * S, D).astype(bf16)
    qkv = jnp.dot(x2d, wqkv_ref[0],
                  preferred_element_type=jnp.float32) + bqkv_ref[0]   # (NB*S, 3D)

    def split_heads(t):                              # (NB*S, D) -> (NB*H, S, Dh)
        return t.reshape(NB, S, H, Dh).swapaxes(1, 2).reshape(NB * H, S, Dh)

    q = split_heads(qkv[:, :D]).astype(bf16)
    k = split_heads(qkv[:, D:2 * D]).astype(bf16)
    v = split_heads(qkv[:, 2 * D:]).astype(bf16)

    # ---- attention scores + softmax (dense; fine for moderate S) ----
    s = jnp.einsum('bqd,bkd->bqk', q, k,
                   preferred_element_type=jnp.float32)               # (NB*H, S, S)
    mask = mask_ref[...]                                             # (NB, 1, S)
    s = s + jnp.broadcast_to(mask[:, None, :, :],
                             (NB, H, 1, S)).reshape(NB * H, 1, S)
    m = jnp.max(s, axis=-1, keepdims=True)
    p = jnp.exp(s - m)
    p = p * pl.reciprocal(jnp.sum(p, axis=-1, keepdims=True), approx=True)

    ctx = jnp.einsum('bqk,bkd->bqd', p.astype(bf16), v,
                     preferred_element_type=jnp.float32)             # (NB*H, S, Dh)
    # Merge heads -> (NB*S, D), then ONE full-width (K=D) output projection.
    ctx = ctx.reshape(NB, H, S, Dh).swapaxes(1, 2).reshape(NB * S, D)
    attn = jnp.dot(ctx.astype(bf16), wo_ref[0],
                   preferred_element_type=jnp.float32) + bo_ref[0]   # (NB*S, D)

    h1 = _layernorm(x + attn.reshape(NB, S, D), ln1w_ref[0], ln1b_ref[0])

    # ---- feed-forward ----
    ff = jnp.dot(h1.reshape(NB * S, D).astype(bf16), w1_ref[0],
                 preferred_element_type=jnp.float32) + b1_ref[0]
    ff = _gelu_exact(ff)
    ff = jnp.dot(ff.astype(bf16), w2_ref[0],
                 preferred_element_type=jnp.float32) + b2_ref[0]

    out = _layernorm(h1 + ff.reshape(NB, S, D), ln2w_ref[0], ln2b_ref[0])

    # Single store per layer; the encoder's final LayerNorm is fused into the
    # last layer's store (no store -> reload -> store).
    @pl.when(layer != last)
    def _store():
        o_ref[...] = out

    @pl.when(layer == last)
    def _store_final():
        o_ref[...] = _layernorm(out, finw_ref[...], finb_ref[...])


# ------------------------------ pallas wrapper --------------------------------

def encoder_forward(token_ids, mask_bool, params, *, num_heads):
    B, S = token_ids.shape
    D = params["embedding"].shape[1]
    L = params["wqkv"].shape[0]
    d_ff = params["w1"].shape[-1]
    H = num_heads

    # Embedding gather + sqrt(D) scale + positional encoding (plain XLA).
    x0 = (jnp.take(params["embedding"], token_ids, axis=0) * math.sqrt(D)
          + params["pe"][None, :S, :]).astype(jnp.float32)            # (B, S, D)

    if mask_bool is None:
        mask_bias = jnp.zeros((B, 1, S), jnp.float32)
    else:
        mask_bias = jnp.where(mask_bool.reshape(B, 1, S), -1e9, 0.0
                              ).astype(jnp.float32)

    # Batch blocking: NB rows per grid step (whole batch when B is small) so the
    # layer-weight stream is re-fetched B/NB times instead of B times.
    if B <= 8:
        NB = B
    else:
        NB = max(nb for nb in range(1, 9) if B % nb == 0)
    n_bblk = B // NB

    def layer_spec(a):
        nd = a.ndim
        return pl.BlockSpec((1,) + a.shape[1:],
                            lambda b, l, _nd=nd: (l,) + (0,) * (_nd - 1))

    def shared_spec(a):
        nd = a.ndim
        return pl.BlockSpec(a.shape, lambda b, l, _nd=nd: (0,) * _nd)

    in_specs = [
        pl.BlockSpec((NB, S, D), lambda b, l: (b, 0, 0)),     # x0 (scaled emb+pe)
        pl.BlockSpec((NB, 1, S), lambda b, l: (b, 0, 0)),     # additive mask bias
        layer_spec(params["wqkv"]), layer_spec(params["bqkv"]),
        layer_spec(params["wo"]), layer_spec(params["bo"]),
        layer_spec(params["ln1_w"]), layer_spec(params["ln1_b"]),
        layer_spec(params["w1"]), layer_spec(params["b1"]),
        layer_spec(params["w2"]), layer_spec(params["b2"]),
        layer_spec(params["ln2_w"]), layer_spec(params["ln2_b"]),
        shared_spec(params["final_w"]), shared_spec(params["final_b"]),
    ]
    operands = [x0, mask_bias,
                params["wqkv"], params["bqkv"], params["wo"], params["bo"],
                params["ln1_w"], params["ln1_b"],
                params["w1"], params["b1"], params["w2"], params["b2"],
                params["ln2_w"], params["ln2_b"],
                params["final_w"], params["final_b"]]

    # Right-size the VMEM budget from the actual block footprint, capped by the
    # physical VMEM of the current device generation.
    est = (2 * 2 * (3 * D * D + D * D + 2 * D * d_ff)            # 2x-buffered bf16 weights
           + 2 * 4 * (9 * D + d_ff)                              # 2x-buffered biases / LN
           + 4 * 4 * NB * S * D                                  # x0 + resident out (+slack)
           + 4 * (NB * S * 3 * D + 2 * NB * H * S * S
                  + 2 * NB * S * d_ff + 4 * NB * S * D))         # f32 temporaries
    try:
        phys = pltpu.get_tpu_info().vmem_capacity_bytes
    except Exception:
        phys = 64 * 1024 * 1024
    cap = min(int(phys * 0.85), 100 * 1024 * 1024)
    vmem_limit = max(32 * 1024 * 1024, min(int(est * 1.5), cap))

    return pl.pallas_call(
        partial(fused_encoder_kernel, num_heads=num_heads),
        out_shape=jax.ShapeDtypeStruct((B, S, D), jnp.float32),
        grid=(n_bblk, L),
        in_specs=in_specs,
        out_specs=pl.BlockSpec((NB, S, D), lambda b, l: (b, 0, 0)),
        compiler_params=pltpu.CompilerParams(
            dimension_semantics=("parallel", "arbitrary"),
            vmem_limit_bytes=vmem_limit),
    )(*operands)


# ------------------------------ params / glue ---------------------------------

def build_pe(max_len, d_model):
    position = jnp.arange(max_len, dtype=jnp.float32)[:, None]
    div_term = jnp.exp(jnp.arange(0, d_model, 2, dtype=jnp.float32)
                       * (-math.log(10000.0) / d_model))
    pe = jnp.zeros((max_len, d_model), jnp.float32)
    pe = pe.at[:, 0::2].set(jnp.sin(position * div_term))
    pe = pe.at[:, 1::2].set(jnp.cos(position * div_term))
    return pe


def init_params(key, num_layers, d_model, num_heads, d_ff, vocab, max_seq_len):
    keys = jax.random.split(key, 1 + num_layers)
    embedding = jax.random.normal(keys[0], (vocab, d_model), jnp.float32) * 0.02

    def lin(kk, i_dim, o_dim):
        return jax.random.normal(kk, (i_dim, o_dim), jnp.float32) / math.sqrt(i_dim)

    layers = []
    for i in range(num_layers):
        k = jax.random.split(keys[1 + i], 6)
        layers.append(dict(
            wq=lin(k[0], d_model, d_model), bq=jnp.zeros((1, d_model), jnp.float32),
            wk=lin(k[1], d_model, d_model), bk=jnp.zeros((1, d_model), jnp.float32),
            wv=lin(k[2], d_model, d_model), bv=jnp.zeros((1, d_model), jnp.float32),
            wo=lin(k[3], d_model, d_model), bo=jnp.zeros((1, d_model), jnp.float32),
            ln1_w=jnp.ones((1, d_model), jnp.float32),
            ln1_b=jnp.zeros((1, d_model), jnp.float32),
            w1=lin(k[4], d_model, d_ff), b1=jnp.zeros((1, d_ff), jnp.float32),
            w2=lin(k[5], d_ff, d_model), b2=jnp.zeros((1, d_model), jnp.float32),
            ln2_w=jnp.ones((1, d_model), jnp.float32),
            ln2_b=jnp.zeros((1, d_model), jnp.float32),
        ))
    return dict(
        embedding=embedding,
        pe=build_pe(max_seq_len, d_model),
        layers=layers,
        final_w=jnp.ones((1, d_model), jnp.float32),
        final_b=jnp.zeros((1, d_model), jnp.float32),
    )


def pack_params(raw, num_heads):
    """Stack per-layer weights on a leading layer axis, fuse q/k/v into one
    (D, 3D) weight, and fold 1/sqrt(Dh) into the Q columns so the kernel does
    only full-width matmuls with no per-head weight slicing or rescaling."""
    H = num_heads
    D = raw["embedding"].shape[1]
    Dh = D // H
    inv_sqrt_dh = 1.0 / math.sqrt(Dh)
    bf16 = jnp.bfloat16
    layers = raw["layers"]

    def stack(name):
        return jnp.stack([lp[name] for lp in layers])

    wqkv = jnp.concatenate([stack("wq") * inv_sqrt_dh, stack("wk"), stack("wv")],
                           axis=-1)                                   # (L, D, 3D)
    bqkv = jnp.concatenate([stack("bq") * inv_sqrt_dh, stack("bk"), stack("bv")],
                           axis=-1)                                   # (L, 1, 3D)

    return dict(
        embedding=raw["embedding"],
        pe=raw["pe"],
        wqkv=wqkv.astype(bf16), bqkv=bqkv,
        wo=stack("wo").astype(bf16), bo=stack("bo"),
        ln1_w=stack("ln1_w"), ln1_b=stack("ln1_b"),
        w1=stack("w1").astype(bf16), b1=stack("b1"),
        w2=stack("w2").astype(bf16), b2=stack("b2"),
        ln2_w=stack("ln2_w"), ln2_b=stack("ln2_b"),
        final_w=raw["final_w"], final_b=raw["final_b"],
    )


# ----------------------------------- main --------------------------------------

if __name__ == "__main__":
    B, S = 2, 8
    D_MODEL, NUM_HEADS, D_FF = 32, 4, 64
    NUM_LAYERS, VOCAB, MAX_SEQ = 2, 50, 64

    key = jax.random.PRNGKey(0)
    k_param, k_tok = jax.random.split(key)

    raw_params = init_params(k_param, NUM_LAYERS, D_MODEL, NUM_HEADS, D_FF,
                             VOCAB, MAX_SEQ)
    params = pack_params(raw_params, NUM_HEADS)
    token_ids = jax.random.randint(k_tok, (B, S), 0, VOCAB, dtype=jnp.int32)

    # Padding mask in the PyTorch convention: (B, 1, 1, S), True = masked.
    mask_bool = jnp.zeros((B, 1, 1, S), dtype=bool)
    mask_bool = mask_bool.at[1, :, :, S - 2:].set(True)

    out = encoder_forward(token_ids, mask_bool, params, num_heads=NUM_HEADS)
    out = jax.block_until_ready(out)
    assert out.shape == (B, S, D_MODEL)
    assert bool(jnp.all(jnp.isfinite(out)))
    print("KERNEL_OK")
</pallas_src>

<mosaic_0001>
module attributes {stable_mosaic.version = 11 : i64} {
  func.func @fused_encoder_kernel(%arg0: i32, %arg1: i32, %arg2: memref<2x8x32xf32, #tpu.memory_space<vmem>>, %arg3: memref<2x1x8xf32, #tpu.memory_space<vmem>>, %arg4: memref<1x32x96xbf16, #tpu.memory_space<vmem>>, %arg5: memref<1x1x96xf32, #tpu.memory_space<vmem>>, %arg6: memref<1x32x32xbf16, #tpu.memory_space<vmem>>, %arg7: memref<1x1x32xf32, #tpu.memory_space<vmem>>, %arg8: memref<1x1x32xf32, #tpu.memory_space<vmem>>, %arg9: memref<1x1x32xf32, #tpu.memory_space<vmem>>, %arg10: memref<1x32x64xbf16, #tpu.memory_space<vmem>>, %arg11: memref<1x1x64xf32, #tpu.memory_space<vmem>>, %arg12: memref<1x64x32xbf16, #tpu.memory_space<vmem>>, %arg13: memref<1x1x32xf32, #tpu.memory_space<vmem>>, %arg14: memref<1x1x32xf32, #tpu.memory_space<vmem>>, %arg15: memref<1x1x32xf32, #tpu.memory_space<vmem>>, %arg16: memref<1x32xf32, #tpu.memory_space<vmem>>, %arg17: memref<1x32xf32, #tpu.memory_space<vmem>>, %arg18: memref<2x8x32xf32, #tpu.memory_space<vmem>>) attributes {dimension_semantics = [#tpu.dimension_semantics<parallel>, #tpu.dimension_semantics<arbitrary>], iteration_bounds = array<i64: 1, 2>, scalar_prefetch = 0 : i64, scratch_operands = 0 : i64, tpu.core_type = #tpu.core_type<tc>, window_params = [{transform_indices = @transform_0, window_bounds = array<i64: 2, 8, 32>}, {transform_indices = @transform_1, window_bounds = array<i64: 2, 1, 8>}, {transform_indices = @transform_2, window_bounds = array<i64: 1, 32, 96>}, {transform_indices = @transform_3, window_bounds = array<i64: 1, 1, 96>}, {transform_indices = @transform_4, window_bounds = array<i64: 1, 32, 32>}, {transform_indices = @transform_5, window_bounds = array<i64: 1, 1, 32>}, {transform_indices = @transform_6, window_bounds = array<i64: 1, 1, 32>}, {transform_indices = @transform_7, window_bounds = array<i64: 1, 1, 32>}, {transform_indices = @transform_8, window_bounds = array<i64: 1, 32, 64>}, {transform_indices = @transform_9, window_bounds = array<i64: 1, 1, 64>}, {transform_indices = @transform_10, window_bounds = array<i64: 1, 64, 32>}, {transform_indices = @transform_11, window_bounds = array<i64: 1, 1, 32>}, {transform_indices = @transform_12, window_bounds = array<i64: 1, 1, 32>}, {transform_indices = @transform_13, window_bounds = array<i64: 1, 1, 32>}, {pipeline_mode = #tpu.pipeline_mode<synchronous>, transform_indices = @transform_14, window_bounds = array<i64: 1, 32>}, {pipeline_mode = #tpu.pipeline_mode<synchronous>, transform_indices = @transform_15, window_bounds = array<i64: 1, 32>}, {transform_indices = @transform_16, window_bounds = array<i64: 2, 8, 32>}]} {
    %c0_i32 = arith.constant 0 : i32
    %0 = arith.cmpi eq, %arg1, %c0_i32 : i32
    %1 = arith.extui %0 : i1 to i32
    %c0_i32_0 = arith.constant 0 : i32
    %2 = arith.cmpi ne, %1, %c0_i32_0 : i32
    scf.if %2 {
      %c0_65 = arith.constant 0 : index
      %c0_66 = arith.constant 0 : index
      %c0_67 = arith.constant 0 : index
      %150 = vector.load %arg2[%c0_65, %c0_66, %c0_67] : memref<2x8x32xf32, #tpu.memory_space<vmem>>, vector<2x8x32xf32>
      %c0_68 = arith.constant 0 : index
      %c0_69 = arith.constant 0 : index
      %c0_70 = arith.constant 0 : index
      %151 = vector.load %arg18[%c0_68, %c0_69, %c0_70] : memref<2x8x32xf32, #tpu.memory_space<vmem>>, vector<2x8x32xf32>
      tpu.vector_store %arg18[%c0_68, %c0_69, %c0_70], %150 {strides = array<i32>} : memref<2x8x32xf32, #tpu.memory_space<vmem>>, vector<2x8x32xf32>,
    } else {
    }
    %c0 = arith.constant 0 : index
    %c0_1 = arith.constant 0 : index
    %c0_2 = arith.constant 0 : index
    %3 = vector.load %arg18[%c0, %c0_1, %c0_2] : memref<2x8x32xf32, #tpu.memory_space<vmem>>, vector<2x8x32xf32>
    %4 = vector.shape_cast %3 : vector<2x8x32xf32> to vector<16x32xf32>
    %5 = arith.truncf %4 : vector<16x32xf32> to vector<16x32xbf16>
    %c0_3 = arith.constant 0 : index
    %c0_4 = arith.constant 0 : index
    %c0_5 = arith.constant 0 : index
    %6 = vector.load %arg4[%c0_3, %c0_4, %c0_5] : memref<1x32x96xbf16, #tpu.memory_space<vmem>>, vector<1x32x96xbf16>
    %7 = vector.shape_cast %6 : vector<1x32x96xbf16> to vector<32x96xbf16>
    %cst = arith.constant dense<0.000000e+00> : vector<16x96xf32>
    %8 = tpu.matmul %5, %7, %cst {dimension_numbers = #tpu.dot_dimension_numbers<[1], [0], [0], [1], [0, 0, 1, 1], [], []>} : vector<16x32xbf16>, vector<32x96xbf16>, vector<16x96xf32> -> vector<16x96xf32>
    %c0_6 = arith.constant 0 : index
    %c0_7 = arith.constant 0 : index
    %c0_8 = arith.constant 0 : index
    %9 = vector.load %arg5[%c0_6, %c0_7, %c0_8] : memref<1x1x96xf32, #tpu.memory_space<vmem>>, vector<1x1x96xf32>
    %10 = vector.shape_cast %9 : vector<1x1x96xf32> to vector<1x96xf32>
    %11 = vector.broadcast %10 : vector<1x96xf32> to vector<16x96xf32>
    %12 = arith.addf %8, %11 : vector<16x96xf32>
    %13 = vector.extract_strided_slice %12 {offsets = [0, 0], sizes = [16, 32], strides = [1, 1]} : vector<16x96xf32> to vector<16x32xf32>
    %14 = vector.shape_cast %13 : vector<16x32xf32> to vector<2x8x4x8xf32>
    %15 = tpu.transpose %14, [0, 2, 1, 3] : vector<2x8x4x8xf32> -> vector<2x4x8x8xf32>
    %16 = vector.shape_cast %15 : vector<2x4x8x8xf32> to vector<8x8x8xf32>
    %17 = arith.truncf %16 : vector<8x8x8xf32> to vector<8x8x8xbf16>
    %18 = vector.extract_strided_slice %12 {offsets = [0, 32], sizes = [16, 32], strides = [1, 1]} : vector<16x96xf32> to vector<16x32xf32>
    %19 = vector.shape_cast %18 : vector<16x32xf32> to vector<2x8x4x8xf32>
    %20 = tpu.transpose %19, [0, 2, 1, 3] : vector<2x8x4x8xf32> -> vector<2x4x8x8xf32>
    %21 = vector.shape_cast %20 : vector<2x4x8x8xf32> to vector<8x8x8xf32>
    %22 = arith.truncf %21 : vector<8x8x8xf32> to vector<8x8x8xbf16>
    %23 = vector.extract_strided_slice %12 {offsets = [0, 64], sizes = [16, 32], strides = [1, 1]} : vector<16x96xf32> to vector<16x32xf32>
    %24 = vector.shape_cast %23 : vector<16x32xf32> to vector<2x8x4x8xf32>
    %25 = tpu.transpose %24, [0, 2, 1, 3] : vector<2x8x4x8xf32> -> vector<2x4x8x8xf32>
    %26 = vector.shape_cast %25 : vector<2x4x8x8xf32> to vector<8x8x8xf32>
    %27 = arith.truncf %26 : vector<8x8x8xf32> to vector<8x8x8xbf16>
    "tpu.trace_start"() <{level = 10 : i32, message = "bqd,bkd->bqk"}> : () -> ()
    %cst_9 = arith.constant dense<0.000000e+00> : vector<8x8x8xf32>
    %28 = tpu.matmul %17, %22, %cst_9 {dimension_numbers = #tpu.dot_dimension_numbers<[2], [2], [1], [1], [0, 0, 0, 1, 1, 1], [0], [0]>} : vector<8x8x8xbf16>, vector<8x8x8xbf16>, vector<8x8x8xf32> -> vector<8x8x8xf32>
    "tpu.trace_stop"() : () -> ()
    %c0_10 = arith.constant 0 : index
    %c0_11 = arith.constant 0 : index
    %c0_12 = arith.constant 0 : index
    %29 = vector.load %arg3[%c0_10, %c0_11, %c0_12] : memref<2x1x8xf32, #tpu.memory_space<vmem>>, vector<2x1x8xf32>
    %30 = vector.shape_cast %29 : vector<2x1x8xf32> to vector<2x1x1x8xf32>
    %31 = vector.shape_cast %30 : vector<2x1x1x8xf32> to vector<2x1x1x8xf32>
    %32 = vector.broadcast %31 : vector<2x1x1x8xf32> to vector<2x4x1x8xf32>
    %33 = vector.shape_cast %32 : vector<2x4x1x8xf32> to vector<8x1x8xf32>
    %34 = vector.broadcast %33 : vector<8x1x8xf32> to vector<8x8x8xf32>
    %35 = arith.addf %28, %34 : vector<8x8x8xf32>
    %cst_13 = arith.constant dense<0xFF800000> : vector<8x8xf32>
    %36 = vector.multi_reduction <maximumf>, %35, %cst_13 [2] : vector<8x8x8xf32> to vector<8x8xf32>
    %37 = vector.shape_cast %36 : vector<8x8xf32> to vector<8x8x1xf32>
    %38 = vector.broadcast %37 : vector<8x8x1xf32> to vector<8x8x8xf32>
    %39 = arith.subf %35, %38 : vector<8x8x8xf32>
    %40 = math.exp %39 : vector<8x8x8xf32>
    %cst_14 = arith.constant dense<0.000000e+00> : vector<8x8xf32>
    %41 = vector.multi_reduction <add>, %40, %cst_14 [2] : vector<8x8x8xf32> to vector<8x8xf32>
    %42 = vector.shape_cast %41 : vector<8x8xf32> to vector<8x8x1xf32>
    %43 = tpu.reciprocal %42 {approx = true} : vector<8x8x1xf32> -> vector<8x8x1xf32>
    %44 = vector.broadcast %43 : vector<8x8x1xf32> to vector<8x8x8xf32>
    %45 = arith.mulf %40, %44 : vector<8x8x8xf32>
    %46 = arith.truncf %45 : vector<8x8x8xf32> to vector<8x8x8xbf16>
    "tpu.trace_start"() <{level = 10 : i32, message = "bqk,bkd->bqd"}> : () -> ()
    %cst_15 = arith.constant dense<0.000000e+00> : vector<8x8x8xf32>
    %47 = tpu.matmul %46, %27, %cst_15 {dimension_numbers = #tpu.dot_dimension_numbers<[2], [1], [1], [2], [0, 0, 0, 1, 1, 2], [0], [0]>} : vector<8x8x8xbf16>, vector<8x8x8xbf16>, vector<8x8x8xf32> -> vector<8x8x8xf32>
    "tpu.trace_stop"() : () -> ()
    %48 = vector.shape_cast %47 : vector<8x8x8xf32> to vector<2x4x8x8xf32>
    %49 = tpu.transpose %48, [0, 2, 1, 3] : vector<2x4x8x8xf32> -> vector<2x8x4x8xf32>
    %50 = vector.shape_cast %49 : vector<2x8x4x8xf32> to vector<16x32xf32>
    %51 = arith.truncf %50 : vector<16x32xf32> to vector<16x32xbf16>
    %c0_16 = arith.constant 0 : index
    %c0_17 = arith.constant 0 : index
    %c0_18 = arith.constant 0 : index
    %52 = vector.load %arg6[%c0_16, %c0_17, %c0_18] : memref<1x32x32xbf16, #tpu.memory_space<vmem>>, vector<1x32x32xbf16>
    %53 = vector.shape_cast %52 : vector<1x32x32xbf16> to vector<32x32xbf16>
    %cst_19 = arith.constant dense<0.000000e+00> : vector<16x32xf32>
    %54 = tpu.matmul %51, %53, %cst_19 {dimension_numbers = #tpu.dot_dimension_numbers<[1], [0], [0], [1], [0, 0, 1, 1], [], []>} : vector<16x32xbf16>, vector<32x32xbf16>, vector<16x32xf32> -> vector<16x32xf32>
    %c0_20 = arith.constant 0 : index
    %c0_21 = arith.constant 0 : index
    %c0_22 = arith.constant 0 : index
    %55 = vector.load %arg7[%c0_20, %c0_21, %c0_22] : memref<1x1x32xf32, #tpu.memory_space<vmem>>, vector<1x1x32xf32>
    %56 = vector.shape_cast %55 : vector<1x1x32xf32> to vector<1x32xf32>
    %57 = vector.broadcast %56 : vector<1x32xf32> to vector<16x32xf32>
    %58 = arith.addf %54, %57 : vector<16x32xf32>
    %59 = vector.shape_cast %58 : vector<16x32xf32> to vector<2x8x32xf32>
    %60 = arith.addf %3, %59 : vector<2x8x32xf32>
    %c0_23 = arith.constant 0 : index
    %c0_24 = arith.constant 0 : index
    %c0_25 = arith.constant 0 : index
    %61 = vector.load %arg8[%c0_23, %c0_24, %c0_25] : memref<1x1x32xf32, #tpu.memory_space<vmem>>, vector<1x1x32xf32>
    %62 = vector.shape_cast %61 : vector<1x1x32xf32> to vector<1x32xf32>
    %c0_26 = arith.constant 0 : index
    %c0_27 = arith.constant 0 : index
    %c0_28 = arith.constant 0 : index
    %63 = vector.load %arg9[%c0_26, %c0_27, %c0_28] : memref<1x1x32xf32, #tpu.memory_space<vmem>>, vector<1x1x32xf32>
    %64 = vector.shape_cast %63 : vector<1x1x32xf32> to vector<1x32xf32>
    %cst_29 = arith.constant dense<0.000000e+00> : vector<2x8xf32>
    %65 = vector.multi_reduction <add>, %60, %cst_29 [2] : vector<2x8x32xf32> to vector<2x8xf32>
    %66 = vector.shape_cast %65 : vector<2x8xf32> to vector<2x8x1xf32>
    %cst_30 = arith.constant 3.200000e+01 : f32
    %67 = vector.broadcast %cst_30 : f32 to vector<2x8x1xf32>
    %68 = arith.divf %66, %67 : vector<2x8x1xf32>
    %69 = vector.broadcast %68 : vector<2x8x1xf32> to vector<2x8x32xf32>
    %70 = arith.subf %60, %69 : vector<2x8x32xf32>
    %71 = arith.mulf %70, %70 : vector<2x8x32xf32>
    %cst_31 = arith.constant dense<0.000000e+00> : vector<2x8xf32>
    %72 = vector.multi_reduction <add>, %71, %cst_31 [2] : vector<2x8x32xf32> to vector<2x8xf32>
    %73 = vector.shape_cast %72 : vector<2x8xf32> to vector<2x8x1xf32>
    %cst_32 = arith.constant 3.200000e+01 : f32
    %74 = vector.broadcast %cst_32 : f32 to vector<2x8x1xf32>
    %75 = arith.divf %73, %74 : vector<2x8x1xf32>
    %76 = vector.broadcast %68 : vector<2x8x1xf32> to vector<2x8x32xf32>
    %77 = arith.subf %60, %76 : vector<2x8x32xf32>
    %cst_33 = arith.constant 9.99999974E-6 : f32
    %78 = vector.broadcast %cst_33 : f32 to vector<2x8x1xf32>
    %79 = arith.addf %75, %78 : vector<2x8x1xf32>
    %80 = math.rsqrt %79 : vector<2x8x1xf32>
    %81 = vector.broadcast %80 : vector<2x8x1xf32> to vector<2x8x32xf32>
    %82 = arith.mulf %77, %81 : vector<2x8x32xf32>
    %83 = vector.shape_cast %62 : vector<1x32xf32> to vector<1x1x32xf32>
    %84 = vector.broadcast %83 : vector<1x1x32xf32> to vector<2x8x32xf32>
    %85 = arith.mulf %82, %84 : vector<2x8x32xf32>
    %86 = vector.shape_cast %64 : vector<1x32xf32> to vector<1x1x32xf32>
    %87 = vector.broadcast %86 : vector<1x1x32xf32> to vector<2x8x32xf32>
    %88 = arith.addf %85, %87 : vector<2x8x32xf32>
    %89 = vector.shape_cast %88 : vector<2x8x32xf32> to vector<16x32xf32>
    %90 = arith.truncf %89 : vector<16x32xf32> to vector<16x32xbf16>
    %c0_34 = arith.constant 0 : index
    %c0_35 = arith.constant 0 : index
    %c0_36 = arith.constant 0 : index
    %91 = vector.load %arg10[%c0_34, %c0_35, %c0_36] : memref<1x32x64xbf16, #tpu.memory_space<vmem>>, vector<1x32x64xbf16>
    %92 = vector.shape_cast %91 : vector<1x32x64xbf16> to vector<32x64xbf16>
    %cst_37 = arith.constant dense<0.000000e+00> : vector<16x64xf32>
    %93 = tpu.matmul %90, %92, %cst_37 {dimension_numbers = #tpu.dot_dimension_numbers<[1], [0], [0], [1], [0, 0, 1, 1], [], []>} : vector<16x32xbf16>, vector<32x64xbf16>, vector<16x64xf32> -> vector<16x64xf32>
    %c0_38 = arith.constant 0 : index
    %c0_39 = arith.constant 0 : index
    %c0_40 = arith.constant 0 : index
    %94 = vector.load %arg11[%c0_38, %c0_39, %c0_40] : memref<1x1x64xf32, #tpu.memory_space<vmem>>, vector<1x1x64xf32>
    %95 = vector.shape_cast %94 : vector<1x1x64xf32> to vector<1x64xf32>
    %96 = vector.broadcast %95 : vector<1x64xf32> to vector<16x64xf32>
    %97 = arith.addf %93, %96 : vector<16x64xf32>
    %cst_41 = arith.constant 5.000000e-01 : f32
    %98 = vector.broadcast %cst_41 : f32 to vector<16x64xf32>
    %99 = arith.mulf %98, %97 : vector<16x64xf32>
    %cst_42 = arith.constant 0.707106769 : f32
    %100 = vector.broadcast %cst_42 : f32 to vector<16x64xf32>
    %101 = arith.mulf %97, %100 : vector<16x64xf32>
    %102 = math.erf %101 : vector<16x64xf32>
    %cst_43 = arith.constant 1.000000e+00 : f32
    %103 = vector.broadcast %cst_43 : f32 to vector<16x64xf32>
    %104 = arith.addf %103, %102 : vector<16x64xf32>
    %105 = arith.mulf %99, %104 : vector<16x64xf32>
    %106 = arith.truncf %105 : vector<16x64xf32> to vector<16x64xbf16>
    %c0_44 = arith.constant 0 : index
    %c0_45 = arith.constant 0 : index
    %c0_46 = arith.constant 0 : index
    %107 = vector.load %arg12[%c0_44, %c0_45, %c0_46] : memref<1x64x32xbf16, #tpu.memory_space<vmem>>, vector<1x64x32xbf16>
    %108 = vector.shape_cast %107 : vector<1x64x32xbf16> to vector<64x32xbf16>
    %cst_47 = arith.constant dense<0.000000e+00> : vector<16x32xf32>
    %109 = tpu.matmul %106, %108, %cst_47 {dimension_numbers = #tpu.dot_dimension_numbers<[1], [0], [0], [1], [0, 0, 1, 1], [], []>} : vector<16x64xbf16>, vector<64x32xbf16>, vector<16x32xf32> -> vector<16x32xf32>
    %c0_48 = arith.constant 0 : index
    %c0_49 = arith.constant 0 : index
    %c0_50 = arith.constant 0 : index
    %110 = vector.load %arg13[%c0_48, %c0_49, %c0_50] : memref<1x1x32xf32, #tpu.memory_space<vmem>>, vector<1x1x32xf32>
    %111 = vector.shape_cast %110 : vector<1x1x32xf32> to vector<1x32xf32>
    %112 = vector.broadcast %111 : vector<1x32xf32> to vector<16x32xf32>
    %113 = arith.addf %109, %112 : vector<16x32xf32>
    %114 = vector.shape_cast %113 : vector<16x32xf32> to vector<2x8x32xf32>
    %115 = arith.addf %88, %114 : vector<2x8x32xf32>
    %c0_51 = arith.constant 0 : index
    %c0_52 = arith.constant 0 : index
    %c0_53 = arith.constant 0 : index
    %116 = vector.load %arg14[%c0_51, %c0_52, %c0_53] : memref<1x1x32xf32, #tpu.memory_space<vmem>>, vector<1x1x32xf32>
    %117 = vector.shape_cast %116 : vector<1x1x32xf32> to vector<1x32xf32>
    %c0_54 = arith.constant 0 : index
    %c0_55 = arith.constant 0 : index
    %c0_56 = arith.constant 0 : index
    %118 = vector.load %arg15[%c0_54, %c0_55, %c0_56] : memref<1x1x32xf32, #tpu.memory_space<vmem>>, vector<1x1x32xf32>
    %119 = vector.shape_cast %118 : vector<1x1x32xf32> to vector<1x32xf32>
    %cst_57 = arith.constant dense<0.000000e+00> : vector<2x8xf32>
    %120 = vector.multi_reduction <add>, %115, %cst_57 [2] : vector<2x8x32xf32> to vector<2x8xf32>
    %121 = vector.shape_cast %120 : vector<2x8xf32> to vector<2x8x1xf32>
    %cst_58 = arith.constant 3.200000e+01 : f32
    %122 = vector.broadcast %cst_58 : f32 to vector<2x8x1xf32>
    %123 = arith.divf %121, %122 : vector<2x8x1xf32>
    %124 = vector.broadcast %123 : vector<2x8x1xf32> to vector<2x8x32xf32>
    %125 = arith.subf %115, %124 : vector<2x8x32xf32>
    %126 = arith.mulf %125, %125 : vector<2x8x32xf32>
    %cst_59 = arith.constant dense<0.000000e+00> : vector<2x8xf32>
    %127 = vector.multi_reduction <add>, %126, %cst_59 [2] : vector<2x8x32xf32> to vector<2x8xf32>
    %128 = vector.shape_cast %127 : vector<2x8xf32> to vector<2x8x1xf32>
    %cst_60 = arith.constant 3.200000e+01 : f32
    %129 = vector.broadcast %cst_60 : f32 to vector<2x8x1xf32>
    %130 = arith.divf %128, %129 : vector<2x8x1xf32>
    %131 = vector.broadcast %123 : vector<2x8x1xf32> to vector<2x8x32xf32>
    %132 = arith.subf %115, %131 : vector<2x8x32xf32>
    %cst_61 = arith.constant 9.99999974E-6 : f32
    %133 = vector.broadcast %cst_61 : f32 to vector<2x8x1xf32>
    %134 = arith.addf %130, %133 : vector<2x8x1xf32>
    %135 = math.rsqrt %134 : vector<2x8x1xf32>
    %136 = vector.broadcast %135 : vector<2x8x1xf32> to vector<2x8x32xf32>
    %137 = arith.mulf %132, %136 : vector<2x8x32xf32>
    %138 = vector.shape_cast %117 : vector<1x32xf32> to vector<1x1x32xf32>
    %139 = vector.broadcast %138 : vector<1x1x32xf32> to vector<2x8x32xf32>
    %140 = arith.mulf %137, %139 : vector<2x8x32xf32>
    %141 = vector.shape_cast %119 : vector<1x32xf32> to vector<1x1x32xf32>
    %142 = vector.broadcast %141 : vector<1x1x32xf32> to vector<2x8x32xf32>
    %143 = arith.addf %140, %142 : vector<2x8x32xf32>
    %c1_i32 = arith.constant 1 : i32
    %144 = arith.cmpi ne, %arg1, %c1_i32 : i32
    %145 = arith.extui %144 : i1 to i32
    %c0_i32_62 = arith.constant 0 : i32
    %146 = arith.cmpi ne, %145, %c0_i32_62 : i32
    scf.if %146 {
      %c0_65 = arith.constant 0 : index
      %c0_66 = arith.constant 0 : index
      %c0_67 = arith.constant 0 : index
      %150 = vector.load %arg18[%c0_65, %c0_66, %c0_67] : memref<2x8x32xf32, #tpu.memory_space<vmem>>, vector<2x8x32xf32>
      tpu.vector_store %arg18[%c0_65, %c0_66, %c0_67], %143 {strides = array<i32>} : memref<2x8x32xf32, #tpu.memory_space<vmem>>, vector<2x8x32xf32>,
    } else {
    }
    %c1_i32_63 = arith.constant 1 : i32
    %147 = arith.cmpi eq, %arg1, %c1_i32_63 : i32
    %148 = arith.extui %147 : i1 to i32
    %c0_i32_64 = arith.constant 0 : i32
    %149 = arith.cmpi ne, %148, %c0_i32_64 : i32
    scf.if %149 {
      %c0_65 = arith.constant 0 : index
      %c0_66 = arith.constant 0 : index
      %150 = vector.load %arg16[%c0_65, %c0_66] : memref<1x32xf32, #tpu.memory_space<vmem>>, vector<1x32xf32>
      %c0_67 = arith.constant 0 : index
      %c0_68 = arith.constant 0 : index
      %151 = vector.load %arg17[%c0_67, %c0_68] : memref<1x32xf32, #tpu.memory_space<vmem>>, vector<1x32xf32>
      %cst_69 = arith.constant dense<0.000000e+00> : vector<2x8xf32>
      %152 = vector.multi_reduction <add>, %143, %cst_69 [2] : vector<2x8x32xf32> to vector<2x8xf32>
      %153 = vector.shape_cast %152 : vector<2x8xf32> to vector<2x8x1xf32>
      %cst_70 = arith.constant 3.200000e+01 : f32
      %154 = vector.broadcast %cst_70 : f32 to vector<2x8x1xf32>
      %155 = arith.divf %153, %154 : vector<2x8x1xf32>
      %156 = vector.broadcast %155 : vector<2x8x1xf32> to vector<2x8x32xf32>
      %157 = arith.subf %143, %156 : vector<2x8x32xf32>
      %158 = arith.mulf %157, %157 : vector<2x8x32xf32>
      %cst_71 = arith.constant dense<0.000000e+00> : vector<2x8xf32>
      %159 = vector.multi_reduction <add>, %158, %cst_71 [2] : vector<2x8x32xf32> to vector<2x8xf32>
      %160 = vector.shape_cast %159 : vector<2x8xf32> to vector<2x8x1xf32>
      %cst_72 = arith.constant 3.200000e+01 : f32
      %161 = vector.broadcast %cst_72 : f32 to vector<2x8x1xf32>
      %162 = arith.divf %160, %161 : vector<2x8x1xf32>
      %163 = vector.broadcast %155 : vector<2x8x1xf32> to vector<2x8x32xf32>
      %164 = arith.subf %143, %163 : vector<2x8x32xf32>
      %cst_73 = arith.constant 9.99999974E-6 : f32
      %165 = vector.broadcast %cst_73 : f32 to vector<2x8x1xf32>
      %166 = arith.addf %162, %165 : vector<2x8x1xf32>
      %167 = math.rsqrt %166 : vector<2x8x1xf32>
      %168 = vector.broadcast %167 : vector<2x8x1xf32> to vector<2x8x32xf32>
      %169 = arith.mulf %164, %168 : vector<2x8x32xf32>
      %170 = vector.shape_cast %150 : vector<1x32xf32> to vector<1x1x32xf32>
      %171 = vector.broadcast %170 : vector<1x1x32xf32> to vector<2x8x32xf32>
      %172 = arith.mulf %169, %171 : vector<2x8x32xf32>
      %173 = vector.shape_cast %151 : vector<1x32xf32> to vector<1x1x32xf32>
      %174 = vector.broadcast %173 : vector<1x1x32xf32> to vector<2x8x32xf32>
      %175 = arith.addf %172, %174 : vector<2x8x32xf32>
      %c0_74 = arith.constant 0 : index
      %c0_75 = arith.constant 0 : index
      %c0_76 = arith.constant 0 : index
      %176 = vector.load %arg18[%c0_74, %c0_75, %c0_76] : memref<2x8x32xf32, #tpu.memory_space<vmem>>, vector<2x8x32xf32>
      tpu.vector_store %arg18[%c0_74, %c0_75, %c0_76], %175 {strides = array<i32>} : memref<2x8x32xf32, #tpu.memory_space<vmem>>, vector<2x8x32xf32>,
    } else {
    }
    return
  }
  func.func @transform_0(%arg0: i32, %arg1: i32) -> (i32, i32, i32) {
    %c0_i32 = arith.constant 0 : i32
    %c0_i32_0 = arith.constant 0 : i32
    %c0_i32_1 = arith.constant 0 : i32
    return %arg0, %c0_i32, %c0_i32_0 : i32, i32, i32
  }
  func.func @transform_1(%arg0: i32, %arg1: i32) -> (i32, i32, i32) {
    %c0_i32 = arith.constant 0 : i32
    %c0_i32_0 = arith.constant 0 : i32
    %c0_i32_1 = arith.constant 0 : i32
    return %arg0, %c0_i32, %c0_i32_0 : i32, i32, i32
  }
  func.func @transform_2(%arg0: i32, %arg1: i32) -> (i32, i32, i32) {
    %c0_i32 = arith.constant 0 : i32
    %c0_i32_0 = arith.constant 0 : i32
    %c0_i32_1 = arith.constant 0 : i32
    return %arg1, %c0_i32, %c0_i32_0 : i32, i32, i32
  }
  func.func @transform_3(%arg0: i32, %arg1: i32) -> (i32, i32, i32) {
    %c0_i32 = arith.constant 0 : i32
    %c0_i32_0 = arith.constant 0 : i32
    %c0_i32_1 = arith.constant 0 : i32
    return %arg1, %c0_i32, %c0_i32_0 : i32, i32, i32
  }
  func.func @transform_4(%arg0: i32, %arg1: i32) -> (i32, i32, i32) {
    %c0_i32 = arith.constant 0 : i32
    %c0_i32_0 = arith.constant 0 : i32
    %c0_i32_1 = arith.constant 0 : i32
    return %arg1, %c0_i32, %c0_i32_0 : i32, i32, i32
  }
  func.func @transform_5(%arg0: i32, %arg1: i32) -> (i32, i32, i32) {
    %c0_i32 = arith.constant 0 : i32
    %c0_i32_0 = arith.constant 0 : i32
    %c0_i32_1 = arith.constant 0 : i32
    return %arg1, %c0_i32, %c0_i32_0 : i32, i32, i32
  }
  func.func @transform_6(%arg0: i32, %arg1: i32) -> (i32, i32, i32) {
    %c0_i32 = arith.constant 0 : i32
    %c0_i32_0 = arith.constant 0 : i32
    %c0_i32_1 = arith.constant 0 : i32
    return %arg1, %c0_i32, %c0_i32_0 : i32, i32, i32
  }
  func.func @transform_7(%arg0: i32, %arg1: i32) -> (i32, i32, i32) {
    %c0_i32 = arith.constant 0 : i32
    %c0_i32_0 = arith.constant 0 : i32
    %c0_i32_1 = arith.constant 0 : i32
    return %arg1, %c0_i32, %c0_i32_0 : i32, i32, i32
  }
  func.func @transform_8(%arg0: i32, %arg1: i32) -> (i32, i32, i32) {
    %c0_i32 = arith.constant 0 : i32
    %c0_i32_0 = arith.constant 0 : i32
    %c0_i32_1 = arith.constant 0 : i32
    return %arg1, %c0_i32, %c0_i32_0 : i32, i32, i32
  }
  func.func @transform_9(%arg0: i32, %arg1: i32) -> (i32, i32, i32) {
    %c0_i32 = arith.constant 0 : i32
    %c0_i32_0 = arith.constant 0 : i32
    %c0_i32_1 = arith.constant 0 : i32
    return %arg1, %c0_i32, %c0_i32_0 : i32, i32, i32
  }
  func.func @transform_10(%arg0: i32, %arg1: i32) -> (i32, i32, i32) {
    %c0_i32 = arith.constant 0 : i32
    %c0_i32_0 = arith.constant 0 : i32
    %c0_i32_1 = arith.constant 0 : i32
    return %arg1, %c0_i32, %c0_i32_0 : i32, i32, i32
  }
  func.func @transform_11(%arg0: i32, %arg1: i32) -> (i32, i32, i32) {
    %c0_i32 = arith.constant 0 : i32
    %c0_i32_0 = arith.constant 0 : i32
    %c0_i32_1 = arith.constant 0 : i32
    return %arg1, %c0_i32, %c0_i32_0 : i32, i32, i32
  }
  func.func @transform_12(%arg0: i32, %arg1: i32) -> (i32, i32, i32) {
    %c0_i32 = arith.constant 0 : i32
    %c0_i32_0 = arith.constant 0 : i32
    %c0_i32_1 = arith.constant 0 : i32
    return %arg1, %c0_i32, %c0_i32_0 : i32, i32, i32
  }
  func.func @transform_13(%arg0: i32, %arg1: i32) -> (i32, i32, i32) {
    %c0_i32 = arith.constant 0 : i32
    %c0_i32_0 = arith.constant 0 : i32
    %c0_i32_1 = arith.constant 0 : i32
    return %arg1, %c0_i32, %c0_i32_0 : i32, i32, i32
  }
  func.func @transform_14(%arg0: i32, %arg1: i32) -> (i32, i32) {
    %c0_i32 = arith.constant 0 : i32
    %c0_i32_0 = arith.constant 0 : i32
    %c0_i32_1 = arith.constant 0 : i32
    return %c0_i32, %c0_i32_0 : i32, i32
  }
  func.func @transform_15(%arg0: i32, %arg1: i32) -> (i32, i32) {
    %c0_i32 = arith.constant 0 : i32
    %c0_i32_0 = arith.constant 0 : i32
    %c0_i32_1 = arith.constant 0 : i32
    return %c0_i32, %c0_i32_0 : i32, i32
  }
  func.func @transform_16(%arg0: i32, %arg1: i32) -> (i32, i32, i32) {
    %c0_i32 = arith.constant 0 : i32
    %c0_i32_0 = arith.constant 0 : i32
    %c0_i32_1 = arith.constant 0 : i32
    return %arg0, %c0_i32, %c0_i32_0 : i32, i32, i32
  }
}

</mosaic_0001>

<bundles_post_ra>
// kernel: tpu_custom_call.1
= control target key start
LH: loop header
LB: loop body
LE: loop exit
PB: predicated region body
PF: predicated region fallthrough
CT: control target
= control target key end

     0   :  { %s4729_s0 = inlined_call_operand.hbm [shape: f32[2,8,32], index: 0, kind: input, shape index: {}]   ;;  %s4730_s1 = inlined_call_operand.hbm [shape: f32[2,1,8], index: 1, kind: input, shape index: {}]   ;;  %s4731_s2 = inlined_call_operand.vmem [shape: bf16[2,32,96], index: 2, kind: input, shape index: {}]   ;;  %s4732_s3 = inlined_call_operand.vmem [shape: f32[2,1,96], index: 3, kind: input, shape index: {}]   ;;  %s4733_s4 = inlined_call_operand.vmem [shape: bf16[2,32,32], index: 4, kind: input, shape index: {}]   ;;  %s4734_s5 = inlined_call_operand.vmem [shape: f32[2,1,32], index: 5, kind: input, shape index: {}]   ;;  %s4735_s6 = inlined_call_operand.vmem [shape: f32[2,1,32], index: 6, kind: input, shape index: {}]   ;;  %s4736_s7 = inlined_call_operand.vmem [shape: f32[2,1,32], index: 7, kind: input, shape index: {}]   ;;  %s4737_s8 = inlined_call_operand.vmem [shape: bf16[2,32,64], index: 8, kind: input, shape index: {}]   ;;  %s4738_s9 = inlined_call_operand.vmem [shape: f32[2,1,64], index: 9, kind: input, shape index: {}]   ;;  %s4739_s10 = inlined_call_operand.vmem [shape: bf16[2,64,32], index: 10, kind: input, shape index: {}]   ;;  %s4740_s11 = inlined_call_operand.vmem [shape: f32[2,1,32], index: 11, kind: input, shape index: {}]   ;;  %s4741_s12 = inlined_call_operand.vmem [shape: f32[2,1,32], index: 12, kind: input, shape index: {}]   ;;  %s4742_s13 = inlined_call_operand.vmem [shape: f32[2,1,32], index: 13, kind: input, shape index: {}]   ;;  %s4743_s14 = inlined_call_operand.vmem [shape: f32[1,32], index: 14, kind: input, shape index: {}]   ;;  %s4744_s15 = inlined_call_operand.vmem [shape: f32[1,32], index: 15, kind: input, shape index: {}]   ;;  %s4745_s16 = inlined_call_operand.hbm [shape: f32[2,8,32], index: 16, kind: output, shape index: {}]  }
   0x1   :  { %4749 = sst [smem:[#allocation14_spill]] %s4729_s0 }
   0x2   :  { %4750 = sst [smem:[#allocation15_spill]] %s4730_s1 }
   0x3   :  { %4751 = sst [smem:[#allocation16_spill]] %s4731_s2 }
   0x4   :  { %4752 = sst [smem:[#allocation17_spill]] %s4733_s4 }
   0x5   :  { %4753 = sst [smem:[#allocation18_spill]] %s4743_s14 }
   0x6   :  { %4754 = sst [smem:[#allocation19_spill]] %s4744_s15 }
   0x7   :  { %4755 = sst [smem:[#allocation20_spill]] %s4745_s16 }
   0x8   :  { %21 = vsyncpa [#allocation3], 0 }
   0x9   :  { %22 = vsyncpa [#allocation6], 0 }
   0xa   :  { %23 = vsyncpa [#allocation4], 0  ;;  %s4087_s21 = smov 0   ;;  %s4089_s22 = smov 0  }
   0xb   :  { %s4091_s23 = smov 0  }
   0xc LB: > { %4756 = sst [smem:[#allocation11_spill]] %s3976_s22  ;;  %s4746_s24 = sadd.s32 4294967295, %s3980_s23   ;;  %s3980_s23 = sphi %s4091_s23, %s29_s23   ;;  %s3976_s22 = sphi %s4089_s22, %s4778_s22   ;;  %s3972_s21 = sphi %s4087_s21, %s4777_s21  }
   0xd   : > { %4757 = sst [smem:[#allocation12_spill]] %s3980_s23  ;;  %s38_s25 = sadd.s32 1, %s3976_s22 }
   0xe   : > { %p39_p0 = scmp.ge.s32.totalorder %s38_s25, 2  ;;  %p3464_p1 = scmp.ge.s32.totalorder %s3980_s23, 1 }
   0xf   : > { %p478_p2 = scmp.lt.s32.totalorder %s3980_s23, 3  ;;  %p4114_p4 = scmp.eq.s32.totalorder %s4746_s24, 0 }
  0x10   : > { %s4780_s25 = smov (%p39_p0, %s38_s25), 0  ;;  %s3982_s28 = smov [#allocation2]  }
  0x11   : > { %4758 = sst [smem:[#allocation13_spill]] %s4780_s25  ;;  %p4108_p3 = pnand %p3464_p1, %p478_p2 }
  0x12   : > { %s493_s29 = sshll.u32 %s3982_s28, 4  ;;  %s3983_s0 = smov [#allocation5]   ;;  %s494_s29 = int_to_ptr.vmem [resolvable:$true] %s493_s29 }
  0x13   : > { %p3738_p5 = pneg %p4108_p3  ;;  %s509_s17 = sshll.u32 %s3983_s0, 4  ;;  %s510_s17 = int_to_ptr.vmem [resolvable:$true] %s509_s17 }
  0x14   : > { %s3881_s18 = scalar_lea.vmem %s494_s29, 256  ;;  %p3889_p11 = scmp.lt.s32.totalorder %s494_s29, %s494_s29 }
  0x15   : > { %p4122_p6 = pnand %p4114_p4, %p3738_p5  ;;  %p3882_p8 = scmp.ne.s32.totalorder %s494_s29, %s3881_s18 }
  0x16   : > { %p3890_p12 = scmp.lt.s32.totalorder %s3881_s18, %s3881_s18 }
  0x17   : > { %p3872_p7 = pneg %p4122_p6 }
  0x18   : > { %p3891_p13 = por %p3890_p12, %p3889_p11 }
  0x19   : > { %p3884_p9 = pnand %p3882_p8, %p3872_p7 }
  0x1b   : > { %p3885_p10 = pneg %p3884_p9 }
  0x1d   : > { %p3892_p0 = pnand %p3891_p13, %p3885_p10 }
  0x1f   : > { %3895 = shalt.err (!%p3892_p0)
}
  0x20   : > { %s3984_s19 = smov 128   ;;  %s3985_s20 = smov 8  }
  0x21   : > { %s4762_s24 = sld [smem:[#allocation14_spill]]  ;;  %s3907_s25 = scalar_lea.vmem %s510_s17, 32 }
  0x22   : > { %p3908_p1 = scmp.ne.s32.totalorder %s510_s17, %s3907_s25  ;;  %p3915_p8 = scmp.lt.s32.totalorder %s510_s17, %s510_s17 }
  0x23   : > { %p3916_p9 = scmp.lt.s32.totalorder %s3907_s25, %s3907_s25 }
  0x24   : > { %p3910_p2 = pnand %p3908_p1, %p3872_p7 }
  0x25   : > { %p3917_p11 = por %p3916_p9, %p3915_p8 }
  0x26   : > { %p3911_p5 = pneg %p3910_p2 }
  0x27   : > { %3741 = dma.hbm_to_vmem [thread:$0]  (!%p4122_p6), %s4762_s24, 256, %s494_s29, [#allocation3], %s3984_s19, %s3984_s19, %s3985_s20  }
  0x28   : > { %p3918_p10 = pnand %p3917_p11, %p3911_p5 }
  0x2a   : > { %3921 = shalt.err (!%p3918_p10)
}
  0x2b   : > { %s3986_s18 = smov 16   ;;  %s3987_s22 = smov 1  }
  0x2c   : > { %s4763_s1 = sld [smem:[#allocation15_spill]] }
  0x2e   : > { %611 = sbr.rel (%p4108_p3) target bundleno = 3042 (0xbe2), region = 84 }
  0x32   : > { %3744 = dma.hbm_to_vmem [thread:$0]  (!%p4122_p6), %s4763_s1, 32, %s510_s17, [#allocation6], %s3986_s18, %s3986_s18, %s3987_s22  }
  0x33   : > { %3959 = dma.done.wait (%p4114_p4), [#allocation3], 256  }
  0x34   : > { %3961 = vsyncadd (%p4114_p4), [#allocation3], 4294967040 }
  0x35   : > { %3963 = dma.done.wait (%p4114_p4), [#allocation6], 32  }
  0x36   : > { %3965 = vsyncadd (%p4114_p4), [#allocation6], 4294967264  ;;  %p701_p7 = scmp.lt.s32.totalorder %s3972_s21, 1  ;;  %s4764_s2 = sld [smem:[#allocation16_spill]] }
  0x37   : > { %s4765_s4 = sld [smem:[#allocation17_spill]]  ;;  %p3479_p3 = scmp.ne.s32.totalorder %s3972_s21, 0 }
  0x38   : > { %s4156_s16 = scalar_select %p701_p7, %s3972_s21, 1 }
  0x3a   : > { %s3544_s22 = sshll.u32 %s4156_s16, 4  ;;  %s738_s14 = scalar_lea.vmem %s4740_s11, %s4156_s16 }
  0x3b   : > { %s4186_s27 = scalar_lea.vmem %s4737_s8, %s3544_s22  ;;  %s741_s25 = scalar_lea.vmem %s4741_s12, %s4156_s16 }
  0x3c   : > { %s705_s29 = scalar_lea.vmem %s4764_s2, %s3544_s22  ;;  %s730_s2 = scalar_lea.vmem %s4738_s9, %s4156_s16 }
  0x3d   : > { %s4169_s19 = scalar_lea.vmem %s4765_s4, %s3544_s22  ;;  %s3547_s4 = sshll.u32 %s4156_s16, 5 }
  0x3e   : > { %s4196_s0 = scalar_lea.vmem %s4739_s10, %s3547_s4  ;;  %s744_s15 = scalar_lea.vmem %s4742_s13, %s4156_s16 }
  0x3f   : > { %750 = sbr.rel (%p3479_p3) target bundleno = 70 (0x46), region = 96 }
  0x44   : > { %v751_v0 = vld [vmem:[#allocation2] sm:$0xff]  ;;  %vm753_vm0 = vcmask 261120   ;;  %v752_v1 = vld [vmem:[#allocation2 + $0x8] sm:$0xff] }
  0x45   : > { %754 = vst.msk [vmem:[#allocation7] sm:$0xff] %vm753_vm0, %v751_v0  ;;  %755 = vst.msk [vmem:[#allocation7 + $0x8] sm:$0xff] %vm753_vm0, %v752_v1 }
  0x46 PF: > { %v3810_v2 = vld [vmem:[%s705_s29 + $0x8] sm:$0xff]   ;;  %v3988_v3 = vmov 0.0   ;;  %v3811_v4 = vld [vmem:[%s705_s29] sm:$0xff]   ;;  %vm3989_vm1 = vmmov 0   ;;  %vm782_vm2 = vcmask 261120   ;;  %s4766_s24 = scalar_lea.vmem %s4732_s3, %s4156_s16  ;;  %s3990_s30 = smov 104   ;;  %v852_v23 = vlaneseq }
  0x47   : > { %3594 = vmatprep.subr.bf16.mxu0 %v3988_v3  ;;  %3602 = vmatprep.subr.bf16.mxu1 %v3988_v3  ;;  %v3480_v8 = vld [vmem:[%s4766_s24] ss:$0 sm:$0xff]  ;;  %s3991_s17 = smov 120   ;;  %s3992_s20 = smov 112   ;;  %v3995_v21 = vmov 1983009808  }
  0x48   : > { %3595 = vmatpush3.bf16.msra.mxu0 %v3810_v2  ;;  %3598 = vmatprep.mubr.msk.bf16.mxu0 %vm3989_vm1, %v3988_v3  ;;  %s3993_s28 = smov 96   ;;  %s3994_s1 = smov 64   ;;  %v850_v22 = vunpack.c.l.s4 %v3995_v21  ;;  %v853_v25 = vshrl.u32 %v852_v23, 7  ;;  %v3996_v26 = vmov 1934713408   ;;  %vm1749_vm3 = vcmask 64512  }
  0x49   : > { %3596 = vmatprep.subr.bf16.mxu0 %v3988_v3  ;;  %3604 = vmatprep.mubr.msk.bf16.mxu1 %vm3989_vm1, %v3988_v3  ;;  %v882_v27 = vunpack.c.l.s4 %v3996_v26  ;;  %vm2217_vm4 = vcmask 1043456   ;;  %s3997_s18 = smov 16   ;;  %s3999_s23 = smov 24   ;;  %vm2881_vm5 = vcmask 130048   ;;  %vm2884_vm6 = vcmask 195584  }
  0x4a   : > { %v851_v24 = vunpack.c.0.s8 %v850_v22  ;;  %s4767_s4 = scalar_lea.vmem %s4734_s5, %s4156_s16  ;;  %vm3120_vm7 = vcmask 523264   ;;  %p3536_p4 = scmp.eq.s32.totalorder %s3972_s21, 1 }
  0x4b   : > { %v883_v33 = vunpack.c.0.s8 %v882_v27 }
  0x4c   : > { %v756_v5 = vld [vmem:[#allocation7] sm:$0xff]  ;;  %v757_v6 = vld [vmem:[#allocation7 + $0x8] sm:$0xff]  ;;  %3597 = vmatpush3.bf16.msra.mxu0 %v3811_v4  ;;  %v4253_v29 = vsub.s32 %v851_v24, %v853_v25 }
  0x4d   : > { %v758_v7 = vpack.c.bf16 %v757_v6, %v756_v5  ;;  %3608 = vmatprep.subr.bf16.mxu0 %v3988_v3  ;;  %v4264_v38 = vsub.s32 %v883_v33, %v853_v25 }
  0x4f   : > { %3599 = vmatmul.mubr.msk.bf16.vlgmr.msra.gmra.mxu0 %vm782_vm2, %v758_v7 }
  0x50   : > { %3610 = vmatprep.mubr.msk.bf16.mxu0 %vm3989_vm1, %v3988_v3 }
 0x10f   : > { %v820_v9 = vpop.f32.mrf.mxu0 }
 0x110   : > { %v821_v10 = vadd.f32 %v3480_v8, %v820_v9 }
 0x111   : > { %v3600_v11 = vpop.f32.mrf.mxu0 }
 0x112   : > { %841 = vrot.lane.b32.xlu1 %v821_v10, %s3990_s30  ;;  %829 = vrot.lane.b32.xlu0 %v821_v10, %s3991_s17 }
 0x113   : > { %v823_v12 = vpop.f32.mrf.mxu0 }
 0x114   : > { %v4227_v13 = vadd.f32 %v3480_v8, %v823_v12 }
 0x115   : > { %v3601_v14 = vpop.f32.mrf.mxu0 }
 0x116   : > { %835 = vrot.lane.b32.xlu0 %v821_v10, %s3992_s20  ;;  %831 = vrot.lane.b32.xlu1 %v4227_v13, %s3991_s17 }
 0x11a   : > { %837 = vrot.lane.b32.xlu0 %v4227_v13, %s3992_s20  ;;  %843 = vrot.lane.b32.xlu1 %v4227_v13, %s3990_s30  ;;  %s4769_s20 = scalar_lea.vmem %s4736_s7, %s4156_s16 }
 0x11e   : > { %1127 = vrot.lane.b32.xlu0 %v821_v10, %s3993_s28 }
 0x184   : > { %v4232_v15 = vpop.permute.xlu0 %829  ;;  %v4234_v16 = vpop.permute.xlu1 %841 }
 0x185   : > { %1131 = vrot.lane.b32.xlu1 %v4232_v15, %s3993_s28  ;;  %v863_v30 = vcombine.low %v4232_v15, %v4234_v16  ;;  %v864_v32 = vcombine.high %v4232_v15, %v4234_v16 }
 0x187   : > { %v871_v35 = vrot.slane %v863_v30, %v4253_v29  ;;  %v878_v37 = vrot.slane %v864_v32, %v4253_v29 }
 0x188   : > { %v4237_v17 = vpop.permute.xlu0 %835  ;;  %v4241_v18 = vpop.permute.xlu1 %831 }
 0x189   : > { %1135 = vrot.lane.b32.xlu0 %v4237_v17, %s3993_s28  ;;  %1139 = vrot.lane.b32.xlu1 %v4234_v16, %s3993_s28  ;;  %v847_v28 = vcombine.low %v821_v10, %v4237_v17  ;;  %v848_v31 = vcombine.high %v821_v10, %v4237_v17 }
 0x18b   : > { %v855_v34 = vrot.slane %v847_v28, %v4253_v29  ;;  %v862_v36 = vrot.slane %v848_v31, %v4253_v29 }
 0x18c   : > { %v4245_v19 = vpop.permute.xlu0 %837  ;;  %v4247_v20 = vpop.permute.xlu1 %843 }
 0x18d   : > { %1129 = vrot.lane.b32.xlu0 %v4227_v13, %s3993_s28  ;;  %1133 = vrot.lane.b32.xlu1 %v4241_v18, %s3993_s28  ;;  %v879_v39 = vcombine.low %v855_v34, %v871_v35  ;;  %v880_v40 = vcombine.high %v855_v34, %v871_v35  ;;  %v895_v41 = vcombine.low %v862_v36, %v878_v37 }
 0x18e   : > { %v896_v42 = vcombine.high %v862_v36, %v878_v37  ;;  %v915_v43 = vcombine.low %v4227_v13, %v4245_v19  ;;  %v931_v44 = vcombine.low %v4241_v18, %v4247_v20  ;;  %v916_v47 = vcombine.high %v4227_v13, %v4245_v19 }
 0x18f   : > { %v887_v45 = vrot.slane %v879_v39, %v4264_v38  ;;  %v894_v46 = vrot.slane %v880_v40, %v4264_v38  ;;  %v932_v48 = vcombine.high %v4241_v18, %v4247_v20  ;;  %v903_v49 = vrot.slane %v895_v41, %v4264_v38 }
 0x190   : > { %v910_v50 = vrot.slane %v896_v42, %v4264_v38  ;;  %v923_v51 = vrot.slane %v915_v43, %v4253_v29  ;;  %v939_v52 = vrot.slane %v931_v44, %v4253_v29  ;;  %v1128_v53 = vpop.permute.xlu0 %1127  ;;  %v930_v57 = vrot.slane %v916_v47, %v4253_v29 }
 0x191   : > { %1137 = vrot.lane.b32.xlu0 %v4245_v19, %s3993_s28  ;;  %1141 = vrot.lane.b32.xlu1 %v4247_v20, %s3993_s28  ;;  %v983_v55 = vcombine.low %v887_v45, %v894_v46  ;;  %v3484_v56 = vcombine.high %v887_v45, %v894_v46  ;;  %v946_v58 = vrot.slane %v932_v48, %v4253_v29 }
 0x192   : > { %v999_v59 = vcombine.low %v903_v49, %v910_v50  ;;  %v3485_v60 = vcombine.high %v903_v49, %v910_v50  ;;  %v947_v61 = vcombine.low %v923_v51, %v939_v52  ;;  %v948_v62 = vcombine.high %v923_v51, %v939_v52 }
 0x193   : > { %v963_v6 = vcombine.low %v930_v57, %v946_v58  ;;  %v964_v7 = vcombine.high %v930_v57, %v946_v58  ;;  %v4283_v8 = vrot.slane %v983_v55, %v4253_v29  ;;  %v4286_v9 = vrot.slane %v3484_v56, %v4253_v29 }
 0x194   : > { %v4293_v21 = vrot.slane %v947_v61, %v4264_v38  ;;  %v4296_v22 = vrot.slane %v948_v62, %v4264_v38  ;;  %v4299_v24 = vrot.slane %v999_v59, %v4253_v29  ;;  %v4302_v25 = vrot.slane %v3485_v60, %v4253_v29 }
 0x195   : > { %1431 = vrot.lane.b32.xlu1 %v821_v10, %s3994_s1  ;;  %v4305_v32 = vrot.slane %v963_v6, %v4264_v38  ;;  %v4308_v33 = vrot.slane %v964_v7, %v4264_v38  ;;  %v1015_v41 = vcombine.low %v4283_v8, %v4286_v9  ;;  %v1016_v42 = vcombine.high %v4283_v8, %v4286_v9 }
 0x196   : > { %v1051_v39 = vcombine.low %v4293_v21, %v4296_v22  ;;  %v1031_v43 = vcombine.low %v4299_v24, %v4302_v25 }
 0x1f7   : > { %v1132_v54 = vpop.permute.xlu1 %1131 }
 0x1fb   : > { %v1136_v63 = vpop.permute.xlu0 %1135  ;;  %v1140_v0 = vpop.permute.xlu1 %1139 }
 0x1fc   : > { %v1151_v1 = vcombine.low %v1128_v53, %v1136_v63  ;;  %v1152_v2 = vcombine.high %v1128_v53, %v1136_v63  ;;  %v1167_v4 = vcombine.low %v1132_v54, %v1140_v0  ;;  %v1168_v5 = vcombine.high %v1132_v54, %v1140_v0 }
 0x1fe   : > { %v1159_v10 = vrot.slane %v1151_v1, %v4253_v29  ;;  %v1166_v11 = vrot.slane %v1152_v2, %v4253_v29  ;;  %v1175_v12 = vrot.slane %v1167_v4, %v4253_v29  ;;  %v1182_v14 = vrot.slane %v1168_v5, %v4253_v29 }
 0x1ff   : > { %v1130_v23 = vpop.permute.xlu0 %1129  ;;  %v1134_v31 = vpop.permute.xlu1 %1133 }
 0x200   : > { %v1183_v26 = vcombine.low %v1159_v10, %v1175_v12  ;;  %v1184_v27 = vcombine.high %v1159_v10, %v1175_v12  ;;  %v1199_v28 = vcombine.low %v1166_v11, %v1182_v14  ;;  %v1200_v30 = vcombine.high %v1166_v11, %v1182_v14 }
 0x202   : > { %v1191_v34 = vrot.slane %v1183_v26, %v4264_v38  ;;  %v1198_v35 = vrot.slane %v1184_v27, %v4264_v38  ;;  %v1207_v36 = vrot.slane %v1199_v28, %v4264_v38  ;;  %v1214_v37 = vrot.slane %v1200_v30, %v4264_v38 }
 0x203   : > { %v1138_v40 = vpop.permute.xlu0 %1137  ;;  %v1142_v48 = vpop.permute.xlu1 %1141  ;;  %v3486_v27 = vcombine.high %v4293_v21, %v4296_v22 }
 0x204   : > { %v1287_v44 = vcombine.low %v1191_v34, %v1198_v35  ;;  %v3488_v45 = vcombine.high %v1191_v34, %v1198_v35  ;;  %v1303_v46 = vcombine.low %v1207_v36, %v1214_v37  ;;  %v3489_v47 = vcombine.high %v1207_v36, %v1214_v37 }
 0x205   : > { %v1219_v49 = vcombine.low %v1130_v23, %v1138_v40  ;;  %v1220_v50 = vcombine.high %v1130_v23, %v1138_v40  ;;  %v1235_v51 = vcombine.low %v1134_v31, %v1142_v48  ;;  %v1236_v52 = vcombine.high %v1134_v31, %v1142_v48 }
 0x206   : > { %v1294_v53 = vrot.slane %v1287_v44, %v4253_v29  ;;  %v1302_v54 = vrot.slane %v3488_v45, %v4253_v29  ;;  %v1310_v55 = vrot.slane %v1303_v46, %v4253_v29  ;;  %v1318_v56 = vrot.slane %v3489_v47, %v4253_v29 }
 0x207   : > { %v1227_v57 = vrot.slane %v1219_v49, %v4253_v29  ;;  %v1234_v58 = vrot.slane %v1220_v50, %v4253_v29  ;;  %v1243_v59 = vrot.slane %v1235_v51, %v4253_v29  ;;  %v1250_v60 = vrot.slane %v1236_v52, %v4253_v29 }
 0x208   : > { %v1319_v61 = vcombine.low %v1294_v53, %v1302_v54  ;;  %v1335_v62 = vcombine.low %v1310_v55, %v1318_v56  ;;  %v1320_v63 = vcombine.high %v1294_v53, %v1302_v54  ;;  %v1336_v0 = vcombine.high %v1310_v55, %v1318_v56 }
 0x209   : > { %v1251_v1 = vcombine.low %v1227_v57, %v1243_v59  ;;  %v1252_v2 = vcombine.high %v1227_v57, %v1243_v59  ;;  %v1267_v4 = vcombine.low %v1234_v58, %v1250_v60  ;;  %v1268_v5 = vcombine.high %v1234_v58, %v1250_v60 }
 0x20a   : > { %v1327_v6 = vrot.slane %v1319_v61, %v4264_v38  ;;  %v1343_v7 = vrot.slane %v1335_v62, %v4264_v38  ;;  %v1334_v10 = vrot.slane %v1320_v63, %v4264_v38  ;;  %v1350_v11 = vrot.slane %v1336_v0, %v4264_v38 }
 0x20b   : > { %v1259_v12 = vrot.slane %v1251_v1, %v4264_v38  ;;  %v1266_v14 = vrot.slane %v1252_v2, %v4264_v38  ;;  %v1275_v23 = vrot.slane %v1267_v4, %v4264_v38  ;;  %v1282_v26 = vrot.slane %v1268_v5, %v4264_v38 }
 0x20c   : > { %v1351_v28 = vcombine.low %v1327_v6, %v1343_v7  ;;  %v1352_v30 = vcombine.high %v1327_v6, %v1343_v7  ;;  %v1023_v31 = vrot.slane %v1015_v41, %v4264_v38  ;;  %v1039_v45 = vrot.slane %v1031_v43, %v4264_v38 }
 0x20d   : > { %v1355_v34 = vcombine.low %v1259_v12, %v1266_v14  ;;  %v3490_v35 = vcombine.high %v1259_v12, %v1266_v14  ;;  %v1371_v36 = vcombine.low %v1275_v23, %v1282_v26  ;;  %v3491_v37 = vcombine.high %v1275_v23, %v1282_v26 }
 0x20e   : > { %v1423_v40 = vpack.c.bf16 %v1351_v28, %v1351_v28  ;;  %v1424_v44 = vpack.c.bf16 %v1352_v30, %v1352_v30  ;;  %v1353_v46 = vcombine.low %v1334_v10, %v1350_v11  ;;  %v1067_v41 = vcombine.low %v4305_v32, %v4308_v33 }
 0x20f   : > { %v1362_v47 = vrot.slane %v1355_v34, %v4253_v29  ;;  %v1370_v48 = vrot.slane %v3490_v35, %v4253_v29  ;;  %v1378_v49 = vrot.slane %v1371_v36, %v4253_v29  ;;  %v1386_v50 = vrot.slane %v3491_v37, %v4253_v29 }
 0x210   : > { %v1754_v51 = vsel %vm1749_vm3, %v1423_v40, 0  ;;  %v1800_v52 = vsel %vm1749_vm3, %v1424_v44, 0  ;;  %v1354_v53 = vcombine.high %v1334_v10, %v1350_v11  ;;  %v3487_v43 = vcombine.high %v4305_v32, %v4308_v33 }
 0x211   : > { %3603 = vmatpush3.bf16.xpose.msra.mxu1 %v1754_v51  ;;  %3609 = vmatpush3.bf16.xpose.msra.mxu0 %v1800_v52  ;;  %v1387_v54 = vcombine.low %v1362_v47, %v1370_v48  ;;  %v1403_v55 = vcombine.low %v1378_v49, %v1386_v50  ;;  %v1032_v56 = vcombine.high %v4299_v24, %v4302_v25 }
 0x212   : > { %v1047_v57 = vcombine.low %v1023_v31, %v1039_v45  ;;  %v1048_v58 = vcombine.high %v1023_v31, %v1039_v45  ;;  %3614 = vmatprep.subr.bf16.mxu1 %v3988_v3  ;;  %3620 = vmatprep.subr.bf16.mxu0 %v3988_v3  ;;  %v1425_v59 = vpack.c.bf16 %v1353_v46, %v1353_v46 }
 0x213   : > { %v1426_v60 = vpack.c.bf16 %v1354_v53, %v1354_v53  ;;  %v1395_v61 = vrot.slane %v1387_v54, %v4264_v38  ;;  %v1411_v62 = vrot.slane %v1403_v55, %v4264_v38  ;;  %v1058_v32 = vrot.slane %v1051_v39, %v4253_v29  ;;  %v3496_v55 = vld [vmem:[#allocation5] ss:$0 sm:$0xff] }
 0x214   : > { %v1066_v33 = vrot.slane %v3486_v27, %v4253_v29  ;;  %v1074_v24 = vrot.slane %v1067_v41, %v4253_v29  ;;  %v1030_v25 = vrot.slane %v1016_v42, %v4264_v38  ;;  %v1082_v63 = vrot.slane %v3487_v43, %v4253_v29 }
 0x215   : > { %v1119_v0 = vpack.c.bf16 %v1047_v57, %v1047_v57  ;;  %v1120_v1 = vpack.c.bf16 %v1048_v58, %v1048_v58  ;;  %v1046_v2 = vrot.slane %v1032_v56, %v4264_v38  ;;  %v1846_v4 = vsel %vm1749_vm3, %v1425_v59, 0 }
 0x216   : > { %v1388_v5 = vcombine.high %v1362_v47, %v1370_v48  ;;  %v1892_v21 = vsel %vm1749_vm3, %v1426_v60, 0  ;;  %v1419_v22 = vcombine.low %v1395_v61, %v1411_v62  ;;  %v1420_v39 = vcombine.high %v1395_v61, %v1411_v62 }
 0x217   : > { %v1404_v6 = vcombine.high %v1378_v49, %v1386_v50  ;;  %v1083_v8 = vcombine.low %v1058_v32, %v1066_v33  ;;  %v1049_v9 = vcombine.low %v1030_v25, %v1046_v2  ;;  %v1050_v42 = vcombine.high %v1030_v25, %v1046_v2 }
 0x218   : > { %3605 = vmatmul.mubr.msk.bf16.vlgmr.msra.gmra.mxu1 %vm1749_vm3, %v1119_v0  ;;  %3611 = vmatmul.mubr.msk.bf16.vlgmr.msra.gmra.mxu0 %vm1749_vm3, %v1120_v1  ;;  %v1099_v7 = vcombine.low %v1074_v24, %v1082_v63  ;;  %v1427_v10 = vpack.c.bf16 %v1419_v22, %v1419_v22  ;;  %v1428_v11 = vpack.c.bf16 %v1420_v39, %v1420_v39 }
 0x219   : > { %3615 = vmatpush3.bf16.xpose.msra.mxu1 %v1846_v4  ;;  %3621 = vmatpush3.bf16.xpose.msra.mxu0 %v1892_v21  ;;  %v1402_v12 = vrot.slane %v1388_v5, %v4264_v38  ;;  %v1418_v14 = vrot.slane %v1404_v6, %v4264_v38  ;;  %v1121_v23 = vpack.c.bf16 %v1049_v9, %v1049_v9 }
 0x21a   : > { %3616 = vmatprep.mubr.msk.bf16.mxu1 %vm3989_vm1, %v3988_v3  ;;  %3622 = vmatprep.mubr.msk.bf16.mxu0 %vm3989_vm1, %v3988_v3  ;;  %v1122_v26 = vpack.c.bf16 %v1050_v42, %v1050_v42  ;;  %v1091_v27 = vrot.slane %v1083_v8, %v4264_v38  ;;  %v1107_v28 = vrot.slane %v1099_v7, %v4264_v38  ;;  %v1938_v30 = vsel %vm1749_vm3, %v1427_v10, 0  ;;  %v3497_v42 = vld [vmem:[#allocation5 + $0x1] ss:$0 sm:$0xff] }
 0x21b   : > { %3626 = vmatprep.subr.bf16.mxu1 %v3988_v3  ;;  %3632 = vmatprep.subr.bf16.mxu0 %v3988_v3  ;;  %v1984_v31 = vsel %vm1749_vm3, %v1428_v11, 0  ;;  %v1421_v34 = vcombine.low %v1402_v12, %v1418_v14  ;;  %v1422_v35 = vcombine.high %v1402_v12, %v1418_v14  ;;  %v1084_v36 = vcombine.high %v1058_v32, %v1066_v33 }
 0x21c   : > { %v1115_v37 = vcombine.low %v1091_v27, %v1107_v28  ;;  %v1116_v40 = vcombine.high %v1091_v27, %v1107_v28  ;;  %v1100_v44 = vcombine.high %v1074_v24, %v1082_v63 }
 0x21d   : > { %v1429_v45 = vpack.c.bf16 %v1421_v34, %v1421_v34  ;;  %v1430_v46 = vpack.c.bf16 %v1422_v35, %v1422_v35  ;;  %v1098_v49 = vrot.slane %v1084_v36, %v4264_v38 }
 0x21e   : > { %v1123_v47 = vpack.c.bf16 %v1115_v37, %v1115_v37  ;;  %v1124_v48 = vpack.c.bf16 %v1116_v40, %v1116_v40  ;;  %v1114_v50 = vrot.slane %v1100_v44, %v4264_v38 }
 0x21f   : > { %v2030_v41 = vsel %vm1749_vm3, %v1429_v45, 0  ;;  %v2076_v51 = vsel %vm1749_vm3, %v1430_v46, 0 }
 0x220   : > { %3617 = vmatmul.mubr.msk.bf16.vlgmr.msra.gmra.mxu1 %vm1749_vm3, %v1121_v23  ;;  %3623 = vmatmul.mubr.msk.bf16.vlgmr.msra.gmra.mxu0 %vm1749_vm3, %v1122_v26  ;;  %v1117_v52 = vcombine.low %v1098_v49, %v1114_v50  ;;  %v1118_v53 = vcombine.high %v1098_v49, %v1114_v50 }
 0x221   : > { %3627 = vmatpush3.bf16.xpose.msra.mxu1 %v1938_v30  ;;  %3633 = vmatpush3.bf16.xpose.msra.mxu0 %v1984_v31 }
 0x222   : > { %3628 = vmatprep.mubr.msk.bf16.mxu1 %vm3989_vm1, %v3988_v3  ;;  %3634 = vmatprep.mubr.msk.bf16.mxu0 %vm3989_vm1, %v3988_v3  ;;  %v1125_v43 = vpack.c.bf16 %v1117_v52, %v1117_v52  ;;  %v1126_v54 = vpack.c.bf16 %v1118_v53, %v1118_v53  ;;  %v1432_v52 = vpop.permute.xlu1 %1431 }
 0x223   : > { %3638 = vmatprep.subr.bf16.mxu1 %v3988_v3  ;;  %3644 = vmatprep.subr.bf16.mxu0 %v3988_v3 }
 0x228   : > { %3629 = vmatmul.mubr.msk.bf16.vlgmr.msra.gmra.mxu1 %vm1749_vm3, %v1123_v47  ;;  %3635 = vmatmul.mubr.msk.bf16.vlgmr.msra.gmra.mxu0 %vm1749_vm3, %v1124_v48 }
 0x229   : > { %3639 = vmatpush3.bf16.xpose.msra.mxu1 %v2030_v41  ;;  %3645 = vmatpush3.bf16.xpose.msra.mxu0 %v2076_v51 }
 0x22a   : > { %3640 = vmatprep.mubr.msk.bf16.mxu1 %vm3989_vm1, %v3988_v3  ;;  %3646 = vmatprep.mubr.msk.bf16.mxu0 %vm3989_vm1, %v3988_v3 }
 0x22b   : > { %3650 = vmatprep.subr.bf16.mxu1 %v3988_v3  ;;  %3656 = vmatprep.subr.bf16.mxu0 %v3988_v3 }
 0x230   : > { %3641 = vmatmul.mubr.msk.bf16.vlgmr.msra.gmra.mxu1 %vm1749_vm3, %v1125_v43  ;;  %3647 = vmatmul.mubr.msk.bf16.vlgmr.msra.gmra.mxu0 %vm1749_vm3, %v1126_v54 }
 0x231   : > { %3652 = vmatprep.mubr.msk.bf16.mxu1 %vm3989_vm1, %v3988_v3  ;;  %3658 = vmatprep.mubr.msk.bf16.mxu0 %vm3989_vm1, %v3988_v3 }
 0x2d8   : > { %v1790_v56 = vpop.f32.mrf.mxu1  ;;  %v1836_v57 = vpop.f32.mrf.mxu0 }
 0x2d9   : > { %v4412_v58 = vadd.f32 %v3496_v55, %v1790_v56  ;;  %v4414_v59 = vadd.f32 %v3496_v55, %v1836_v57 }
 0x2da   : > { %v3606_v60 = vpop.f32.mrf.mxu1  ;;  %v3612_v61 = vpop.f32.mrf.mxu0 }
 0x2db   : > { %v2118_v62 = vsel %vm1749_vm3, %v4412_v58, -inf  ;;  %v2121_v32 = vsel %vm1749_vm3, %v4414_v59, -inf }
 0x2dc   : > { %2119 = vmax.xlane.f32.xlu0 %v2118_v62  ;;  %v1793_v33 = vpop.f32.mrf.mxu1  ;;  %2122 = vmax.xlane.f32.xlu1 %v2121_v32  ;;  %v1839_v24 = vpop.f32.mrf.mxu0 }
 0x2de   : > { %v3607_v25 = vpop.f32.mrf.mxu1  ;;  %v3613_v63 = vpop.f32.mrf.mxu0 }
 0x2e0   : > { %v1882_v0 = vpop.f32.mrf.mxu1  ;;  %v1928_v1 = vpop.f32.mrf.mxu0 }
 0x2e1   : > { %v1883_v2 = vadd.f32 %v3496_v55, %v1882_v0  ;;  %v1929_v21 = vadd.f32 %v3496_v55, %v1928_v1 }
 0x2e2   : > { %v3618_v4 = vpop.f32.mrf.mxu1  ;;  %v3624_v5 = vpop.f32.mrf.mxu0 }
 0x2e3   : > { %v2124_v22 = vsel %vm1749_vm3, %v1883_v2, -inf  ;;  %v2127_v7 = vsel %vm1749_vm3, %v1929_v21, -inf }
 0x2e4   : > { %2125 = vmax.xlane.f32.xlu0 %v2124_v22  ;;  %v1885_v39 = vpop.f32.mrf.mxu1  ;;  %v1931_v6 = vpop.f32.mrf.mxu0 }
 0x2e6   : > { %v3619_v8 = vpop.f32.mrf.mxu1  ;;  %v3625_v9 = vpop.f32.mrf.mxu0 }
 0x2e8   : > { %v1974_v10 = vpop.f32.mrf.mxu1  ;;  %2128 = vmax.xlane.f32.xlu0 %v2127_v7  ;;  %v2020_v11 = vpop.f32.mrf.mxu0 }
 0x2e9   : > { %v1975_v12 = vadd.f32 %v3497_v42, %v1974_v10  ;;  %v2021_v14 = vadd.f32 %v3497_v42, %v2020_v11 }
 0x2ea   : > { %v3630_v23 = vpop.f32.mrf.mxu1  ;;  %v3636_v26 = vpop.f32.mrf.mxu0 }
 0x2eb   : > { %v2130_v27 = vsel %vm1749_vm3, %v1975_v12, -inf  ;;  %v2133_v28 = vsel %vm1749_vm3, %v2021_v14, -inf }
 0x2ec   : > { %v1977_v30 = vpop.f32.mrf.mxu1  ;;  %2131 = vmax.xlane.f32.xlu1 %v2130_v27  ;;  %2134 = vmax.xlane.f32.xlu0 %v2133_v28  ;;  %v2023_v31 = vpop.f32.mrf.mxu0 }
 0x2ee   : > { %v3631_v34 = vpop.f32.mrf.mxu1  ;;  %v3637_v35 = vpop.f32.mrf.mxu0 }
 0x2f0   : > { %v2066_v36 = vpop.f32.mrf.mxu1  ;;  %v2112_v37 = vpop.f32.mrf.mxu0 }
 0x2f1   : > { %v4424_v40 = vadd.f32 %v3497_v42, %v2066_v36  ;;  %v4426_v44 = vadd.f32 %v3497_v42, %v2112_v37 }
 0x2f2   : > { %v3642_v45 = vpop.f32.mrf.mxu1  ;;  %v3648_v46 = vpop.f32.mrf.mxu0 }
 0x2f3   : > { %v2136_v47 = vsel %vm1749_vm3, %v4424_v40, -inf  ;;  %v2139_v48 = vsel %vm1749_vm3, %v4426_v44, -inf }
 0x2f4   : > { %v2069_v49 = vpop.f32.mrf.mxu1  ;;  %2137 = vmax.xlane.f32.xlu1 %v2136_v47  ;;  %2140 = vmax.xlane.f32.xlu0 %v2139_v48  ;;  %v2115_v50 = vpop.f32.mrf.mxu0 }
 0x2f6   : > { %v3643_v41 = vpop.f32.mrf.mxu1  ;;  %v3649_v51 = vpop.f32.mrf.mxu0 }
 0x305   : > { %1439 = vrot.lane.b32.xlu1 %v4237_v17, %s3994_s1 }
 0x309   : > { %1443 = vrot.lane.b32.xlu1 %v4234_v16, %s3994_s1 }
 0x30a   : > { %1435 = vrot.lane.b32.xlu0 %v4232_v15, %s3994_s1 }
 0x30d   : > { %1433 = vrot.lane.b32.xlu1 %v4227_v13, %s3994_s1 }
 0x365   : > { %v2120_v53 = vpop.xlane.xlu0 %2119  ;;  %v2123_v43 = vpop.xlane.xlu1 %2122 }
 0x366   : > { %v2142_v54 = vsub.f32 %v4412_v58, %v2120_v53  ;;  %v2143_v55 = vsub.f32 %v4414_v59, %v2123_v43 }
 0x368   : > { %v2150_v56 = vmul.f32 1.442695, %v2142_v54  ;;  %v2152_v57 = vmul.f32 1.442695, %v2143_v55 }
 0x36a   : > { %3820 = vpow2.f32 %v2150_v56 }
 0x36b   : > { %3822 = vpow2.f32 %v2152_v57 }
 0x36d   : > { %v2126_v17 = vpop.xlane.xlu0 %2125 }
 0x36e   : > { %v2144_v60 = vsub.f32 %v1883_v2, %v2126_v17 }
 0x370   : > { %v2154_v16 = vmul.f32 1.442695, %v2144_v60 }
 0x371   : > { %v2129_v61 = vpop.xlane.xlu0 %2128 }
 0x372   : > { %3824 = vpow2.f32 %v2154_v16  ;;  %v2145_v15 = vsub.f32 %v1929_v21, %v2129_v61 }
 0x374   : > { %v2156_v62 = vmul.f32 1.442695, %v2145_v15 }
 0x375   : > { %v2132_v32 = vpop.xlane.xlu1 %2131  ;;  %v2135_v13 = vpop.xlane.xlu0 %2134 }
 0x376   : > { %3826 = vpow2.f32 %v2156_v62  ;;  %v2146_v33 = vsub.f32 %v1975_v12, %v2132_v32  ;;  %v2147_v24 = vsub.f32 %v2021_v14, %v2135_v13 }
 0x377   : > { %v4442_v25 = vpop.eup %3820 }
 0x378   : > { %v4444_v58 = vpop.eup %3822  ;;  %v2158_v59 = vmul.f32 1.442695, %v2146_v33  ;;  %v2160_v63 = vmul.f32 1.442695, %v2147_v24  ;;  %v2166_v0 = vsel %vm1749_vm3, %v4442_v25, 0.0 }
 0x379   : > { %2167 = vadd.xlane.f32.xlu1 %v2166_v0  ;;  %v2169_v1 = vsel %vm1749_vm3, %v4444_v58, 0.0 }
 0x37a   : > { %3828 = vpow2.f32 %v2158_v59  ;;  %2170 = vadd.xlane.f32.xlu0 %v2169_v1 }
 0x37b   : > { %3830 = vpow2.f32 %v2160_v63 }
 0x37d   : > { %v4450_v2 = vpop.xlane.xlu1 %2137  ;;  %v4454_v5 = vpop.xlane.xlu0 %2140 }
 0x37e   : > { %v2148_v1 = vsub.f32 %v4424_v40, %v4450_v2 }
 0x37f   : > { %v4452_v4 = vpop.eup %3824 }
 0x380   : > { %v2172_v21 = vsel %vm1749_vm3, %v4452_v4, 0.0 }
 0x381   : > { %v1440_v22 = vpop.permute.xlu1 %1439  ;;  %2173 = vadd.xlane.f32.xlu0 %v2172_v21  ;;  %v1436_v42 = vpop.permute.xlu0 %1435  ;;  %v2162_v21 = vmul.f32 1.442695, %v2148_v1 }
 0x382   : > { %v1455_v6 = vcombine.low %v1432_v52, %v1440_v22  ;;  %v1456_v8 = vcombine.high %v1432_v52, %v1440_v22 }
 0x383   : > { %v4458_v39 = vpop.eup %3826 }
 0x384   : > { %v2175_v9 = vsel %vm1749_vm3, %v4458_v39, 0.0  ;;  %v1463_v14 = vrot.slane %v1455_v6, %v4253_v29  ;;  %v1470_v26 = vrot.slane %v1456_v8, %v4253_v29 }
 0x385   : > { %v1444_v7 = vpop.permute.xlu1 %1443  ;;  %2176 = vadd.xlane.f32.xlu1 %v2175_v9 }
 0x386   : > { %v1471_v10 = vcombine.low %v1436_v42, %v1444_v7  ;;  %v1472_v11 = vcombine.high %v1436_v42, %v1444_v7 }
 0x387   : > { %v4462_v12 = vpop.eup %3828 }
 0x388   : > { %v4465_v23 = vpop.eup %3830  ;;  %v1479_v27 = vrot.slane %v1471_v10, %v4253_v29  ;;  %v1486_v28 = vrot.slane %v1472_v11, %v4253_v29  ;;  %v2178_v30 = vsel %vm1749_vm3, %v4462_v12, 0.0 }
 0x389   : > { %2179 = vadd.xlane.f32.xlu0 %v2178_v30  ;;  %v2181_v37 = vsel %vm1749_vm3, %v4465_v23, 0.0 }
 0x38a   : > { %v1487_v31 = vcombine.low %v1463_v14, %v1479_v27  ;;  %v1488_v34 = vcombine.high %v1463_v14, %v1479_v27  ;;  %v1503_v35 = vcombine.low %v1470_v26, %v1486_v28  ;;  %v1504_v36 = vcombine.high %v1470_v26, %v1486_v28 }
 0x38c   : > { %v1495_v45 = vrot.slane %v1487_v31, %v4264_v38  ;;  %v1502_v46 = vrot.slane %v1488_v34, %v4264_v38  ;;  %v1511_v47 = vrot.slane %v1503_v35, %v4264_v38  ;;  %v1518_v48 = vrot.slane %v1504_v36, %v4264_v38 }
 0x38d   : > { %2182 = vadd.xlane.f32.xlu0 %v2181_v37 }
 0x38e   : > { %v1591_v49 = vcombine.low %v1495_v45, %v1502_v46  ;;  %v3492_v50 = vcombine.high %v1495_v45, %v1502_v46  ;;  %v1607_v41 = vcombine.low %v1511_v47, %v1518_v48  ;;  %v3493_v51 = vcombine.high %v1511_v47, %v1518_v48 }
 0x390   : > { %v1598_v52 = vrot.slane %v1591_v49, %v4253_v29  ;;  %v1606_v53 = vrot.slane %v3492_v50, %v4253_v29  ;;  %v1614_v43 = vrot.slane %v1607_v41, %v4253_v29  ;;  %v1622_v54 = vrot.slane %v3493_v51, %v4253_v29 }
 0x392   : > { %v1623_v55 = vcombine.low %v1598_v52, %v1606_v53  ;;  %v1639_v56 = vcombine.low %v1614_v43, %v1622_v54  ;;  %v1624_v57 = vcombine.high %v1598_v52, %v1606_v53  ;;  %v1640_v17 = vcombine.high %v1614_v43, %v1622_v54 }
 0x394   : > { %v1631_v60 = vrot.slane %v1623_v55, %v4264_v38  ;;  %v1647_v16 = vrot.slane %v1639_v56, %v4264_v38  ;;  %v1638_v61 = vrot.slane %v1624_v57, %v4264_v38  ;;  %v1654_v15 = vrot.slane %v1640_v17, %v4264_v38 }
 0x396   : > { %1441 = vrot.lane.b32.xlu1 %v4245_v19, %s3994_s1  ;;  %v1655_v62 = vcombine.low %v1631_v60, %v1647_v16  ;;  %v1656_v32 = vcombine.high %v1631_v60, %v1647_v16  ;;  %v1657_v13 = vcombine.low %v1638_v61, %v1654_v15  ;;  %v1658_v33 = vcombine.high %v1638_v61, %v1654_v15 }
 0x397   : > { %v2149_v19 = vsub.f32 %v4426_v44, %v4454_v5  ;;  %v1434_v44 = vpop.permute.xlu1 %1433 }
 0x398   : > { %v1727_v24 = vpack.c.bf16 %v1655_v62, %v1655_v62  ;;  %v1728_v59 = vpack.c.bf16 %v1656_v32, %v1656_v32  ;;  %v1729_v11 = vpack.c.bf16 %v1657_v13, %v1657_v13  ;;  %v1730_v27 = vpack.c.bf16 %v1658_v33, %v1658_v33 }
 0x39a   : > { %1445 = vrot.lane.b32.xlu1 %v4247_v20, %s3994_s1  ;;  %v2219_v63 = vsel %vm2217_vm4, %v1727_v24, 0  ;;  %v2265_v0 = vsel %vm2217_vm4, %v1728_v59, 0  ;;  %v2164_v20 = vmul.f32 1.442695, %v2149_v19  ;;  %v2311_v34 = vsel %vm2217_vm4, %v1729_v11, 0 }
 0x39b   : > { %3651 = vmatpush3.bf16.msra.mxu1 %v2219_v63  ;;  %3657 = vmatpush3.bf16.msra.mxu0 %v2265_v0  ;;  %v2357_v35 = vsel %vm2217_vm4, %v1730_v27, 0 }
 0x39c   : > { %3662 = vmatprep.subr.bf16.mxu1 %v3988_v3  ;;  %3668 = vmatprep.subr.bf16.mxu0 %v3988_v3  ;;  %3832 = vpow2.f32 %v2164_v20 }
 0x39d   : > { %3834 = vpow2.f32 %v2162_v21 }
 0x3a3   : > { %1437 = vrot.lane.b32.xlu0 %v4241_v18, %s3994_s1 }
 0x3a9   : > { %v4500_v22 = vpop.eup %3832 }
 0x3aa   : > { %v2187_v6 = vsel %vm1749_vm3, %v4500_v22, 0.0  ;;  %v4504_v8 = vpop.eup %3834 }
 0x3ab   : > { %v2184_v18 = vsel %vm1749_vm3, %v4504_v8, 0.0 }
 0x3be   : > { %2188 = vadd.xlane.f32.xlu1 %v2187_v6 }
 0x3c2   : > { %2185 = vadd.xlane.f32.xlu0 %v2184_v18 }
 0x402   : > { %v2168_v5 = vpop.xlane.xlu1 %2167 }
 0x403   : > { %3836 = vrcp.f32 %v2168_v5  ;;  %v2171_v40 = vpop.xlane.xlu0 %2170 }
 0x404   : > { %3838 = vrcp.f32 %v2171_v40 }
 0x40a   : > { %v2174_v2 = vpop.xlane.xlu0 %2173 }
 0x40b   : > { %3840 = vrcp.f32 %v2174_v2 }
 0x40e   : > { %v2177_v9 = vpop.xlane.xlu1 %2176 }
 0x40f   : > { %3842 = vrcp.f32 %v2177_v9 }
 0x410   : > { %v3837_v42 = vpop.eup %3836 }
 0x411   : > { %v3839_v7 = vpop.eup %3838  ;;  %v2198_v10 = vmul.f32 %v3837_v42, %v4442_v25 }
 0x412   : > { %v2180_v14 = vpop.xlane.xlu0 %2179  ;;  %v2199_v26 = vmul.f32 %v3839_v7, %v4444_v58  ;;  %v1442_v30 = vpop.permute.xlu1 %1441 }
 0x413   : > { %v2206_v28 = vpack.c.bf16 %v2198_v10, %v2198_v10  ;;  %v1523_v58 = vcombine.low %v1434_v44, %v1442_v30  ;;  %v1524_v37 = vcombine.high %v1434_v44, %v1442_v30  ;;  %3844 = vrcp.f32 %v2180_v14 }
 0x414   : > { %v2207_v31 = vpack.c.bf16 %v2199_v26, %v2199_v26 }
 0x415   : > { %3653 = vmatmul.mubr.msk.bf16.vlgmr.msra.gmra.mxu1 %vm1749_vm3, %v2206_v28  ;;  %v1531_v51 = vrot.slane %v1523_v58, %v4253_v29  ;;  %v1538_v52 = vrot.slane %v1524_v37, %v4253_v29 }
 0x416   : > { %3659 = vmatmul.mubr.msk.bf16.vlgmr.msra.gmra.mxu0 %vm1749_vm3, %v2207_v31  ;;  %3663 = vmatpush3.bf16.msra.mxu1 %v2311_v34  ;;  %v2183_v36 = vpop.xlane.xlu0 %2182  ;;  %v1446_v46 = vpop.permute.xlu1 %1445 }
 0x417   : > { %3669 = vmatpush3.bf16.msra.mxu0 %v2357_v35  ;;  %3664 = vmatprep.mubr.msk.bf16.mxu1 %vm3989_vm1, %v3988_v3  ;;  %3846 = vrcp.f32 %v2183_v36 }
 0x418   : > { %v3841_v25 = vpop.eup %3840  ;;  %3670 = vmatprep.mubr.msk.bf16.mxu0 %vm3989_vm1, %v3988_v3  ;;  %3674 = vmatprep.subr.bf16.mxu1 %v3988_v3 }
 0x419   : > { %v2200_v45 = vmul.f32 %v3841_v25, %v4452_v4  ;;  %3680 = vmatprep.subr.bf16.mxu0 %v3988_v3 }
 0x41a   : > { %v1438_v47 = vpop.permute.xlu0 %1437 }
 0x41b   : > { %v1539_v48 = vcombine.low %v1438_v47, %v1446_v46  ;;  %v1540_v49 = vcombine.high %v1438_v47, %v1446_v46  ;;  %v2208_v50 = vpack.c.bf16 %v2200_v45, %v2200_v45 }
 0x41c   : > { %v3843_v41 = vpop.eup %3842 }
 0x41d   : > { %v1547_v53 = vrot.slane %v1539_v48, %v4253_v29  ;;  %v1554_v43 = vrot.slane %v1540_v49, %v4253_v29  ;;  %3665 = vmatmul.mubr.msk.bf16.vlgmr.msra.gmra.mxu1 %vm1749_vm3, %v2208_v50  ;;  %v2201_v4 = vmul.f32 %v3843_v41, %v4458_v39 }
 0x41e   : > { %3676 = vmatprep.mubr.msk.bf16.mxu1 %vm3989_vm1, %v3988_v3 }
 0x41f   : > { %v1555_v54 = vcombine.low %v1531_v51, %v1547_v53  ;;  %v1556_v55 = vcombine.high %v1531_v51, %v1547_v53  ;;  %v1571_v56 = vcombine.low %v1538_v52, %v1554_v43  ;;  %v1572_v57 = vcombine.high %v1538_v52, %v1554_v43 }
 0x420   : > { %v2209_v17 = vpack.c.bf16 %v2201_v4, %v2201_v4  ;;  %v3845_v21 = vpop.eup %3844 }
 0x421   : > { %v1563_v60 = vrot.slane %v1555_v54, %v4264_v38  ;;  %v1570_v16 = vrot.slane %v1556_v55, %v4264_v38  ;;  %v1579_v61 = vrot.slane %v1571_v56, %v4264_v38  ;;  %v1586_v15 = vrot.slane %v1572_v57, %v4264_v38 }
 0x422   : > { %3671 = vmatmul.mubr.msk.bf16.vlgmr.msra.gmra.mxu0 %vm1749_vm3, %v2209_v17  ;;  %v2202_v14 = vmul.f32 %v3845_v21, %v4462_v12 }
 0x423   : > { %v1659_v62 = vcombine.low %v1563_v60, %v1570_v16  ;;  %v3494_v39 = vcombine.high %v1563_v60, %v1570_v16  ;;  %v1675_v32 = vcombine.low %v1579_v61, %v1586_v15  ;;  %v3495_v13 = vcombine.high %v1579_v61, %v1586_v15  ;;  %3682 = vmatprep.mubr.msk.bf16.mxu0 %vm3989_vm1, %v3988_v3 }
 0x424   : > { %v3847_v40 = vpop.eup %3846  ;;  %v2210_v34 = vpack.c.bf16 %v2202_v14, %v2202_v14 }
 0x425   : > { %v1666_v33 = vrot.slane %v1659_v62, %v4253_v29  ;;  %v1674_v24 = vrot.slane %v3494_v39, %v4253_v29  ;;  %v1682_v59 = vrot.slane %v1675_v32, %v4253_v29  ;;  %v1690_v63 = vrot.slane %v3495_v13, %v4253_v29 }
 0x426   : > { %v2203_v26 = vmul.f32 %v3847_v40, %v4465_v23 }
 0x427   : > { %v1691_v0 = vcombine.low %v1666_v33, %v1674_v24  ;;  %v1707_v19 = vcombine.low %v1682_v59, %v1690_v63  ;;  %v1692_v1 = vcombine.high %v1666_v33, %v1674_v24  ;;  %v1708_v20 = vcombine.high %v1682_v59, %v1690_v63 }
 0x428   : > { %v2211_v35 = vpack.c.bf16 %v2203_v26, %v2203_v26 }
 0x429   : > { %v1699_v6 = vrot.slane %v1691_v0, %v4264_v38  ;;  %v1715_v18 = vrot.slane %v1707_v19, %v4264_v38  ;;  %v1706_v44 = vrot.slane %v1692_v1, %v4264_v38  ;;  %v1722_v5 = vrot.slane %v1708_v20, %v4264_v38 }
 0x42b   : > { %v1723_v2 = vcombine.low %v1699_v6, %v1715_v18  ;;  %v1724_v9 = vcombine.high %v1699_v6, %v1715_v18  ;;  %v1725_v42 = vcombine.low %v1706_v44, %v1722_v5  ;;  %v1726_v7 = vcombine.high %v1706_v44, %v1722_v5 }
 0x42d   : > { %v1731_v10 = vpack.c.bf16 %v1723_v2, %v1723_v2  ;;  %v1732_v11 = vpack.c.bf16 %v1724_v9, %v1724_v9  ;;  %v1733_v30 = vpack.c.bf16 %v1725_v42, %v1725_v42  ;;  %v1734_v31 = vpack.c.bf16 %v1726_v7, %v1726_v7 }
 0x42f   : > { %v2403_v27 = vsel %vm2217_vm4, %v1731_v10, 0  ;;  %v2449_v28 = vsel %vm2217_vm4, %v1732_v11, 0  ;;  %v2495_v12 = vsel %vm2217_vm4, %v1733_v30, 0  ;;  %v2541_v23 = vsel %vm2217_vm4, %v1734_v31, 0 }
 0x430   : > { %3675 = vmatpush3.bf16.msra.mxu1 %v2403_v27  ;;  %3681 = vmatpush3.bf16.msra.mxu0 %v2449_v28 }
 0x431   : > { %3686 = vmatprep.subr.bf16.mxu1 %v3988_v3  ;;  %3692 = vmatprep.subr.bf16.mxu0 %v3988_v3 }
 0x433   : > { %3677 = vmatmul.mubr.msk.bf16.vlgmr.msra.gmra.mxu1 %vm1749_vm3, %v2210_v34  ;;  %3683 = vmatmul.mubr.msk.bf16.vlgmr.msra.gmra.mxu0 %vm1749_vm3, %v2211_v35 }
 0x434   : > { %3687 = vmatpush3.bf16.msra.mxu1 %v2495_v12  ;;  %3693 = vmatpush3.bf16.msra.mxu0 %v2541_v23 }
 0x435   : > { %3694 = vmatprep.mubr.msk.bf16.mxu0 %vm3989_vm1, %v3988_v3  ;;  %3688 = vmatprep.mubr.msk.bf16.mxu1 %vm3989_vm1, %v3988_v3 }
 0x436   : > { %3698 = vmatprep.subr.bf16.mxu1 %v3988_v3  ;;  %3706 = vmatprep.subr.bf16.mxu0 %v3988_v3 }
 0x447   : > { %v2189_v36 = vpop.xlane.xlu1 %2188 }
 0x448   : > { %3848 = vrcp.f32 %v2189_v36 }
 0x44b   : > { %v2186_v25 = vpop.xlane.xlu0 %2185 }
 0x44c   : > { %3850 = vrcp.f32 %v2186_v25 }
 0x455   : > { %v3849_v58 = vpop.eup %3848 }
 0x456   : > { %v2205_v37 = vmul.f32 %v3849_v58, %v4500_v22 }
 0x458   : > { %v2213_v45 = vpack.c.bf16 %v2205_v37, %v2205_v37 }
 0x459   : > { %v3851_v46 = vpop.eup %3850 }
 0x45a   : > { %3695 = vmatmul.mubr.msk.bf16.vlgmr.msra.gmra.mxu0 %vm1749_vm3, %v2213_v45  ;;  %v2204_v47 = vmul.f32 %v3851_v46, %v4504_v8 }
 0x45b   : > { %3710 = vmatprep.mubr.msk.bf16.mxu0 %vm3989_vm1, %v3988_v3 }
 0x45c   : > { %v2212_v48 = vpack.c.bf16 %v2204_v47, %v2204_v47 }
 0x45e   : > { %3689 = vmatmul.mubr.msk.bf16.vlgmr.msra.gmra.mxu1 %vm1749_vm3, %v2212_v48 }
 0x45f   : > { %3702 = vmatprep.mubr.msk.bf16.mxu1 %vm3989_vm1, %v3988_v3 }
 0x4d5   : > { %v2255_v49 = vpop.f32.mrf.mxu1 }
 0x4d6   : > { %v2301_v50 = vpop.f32.mrf.mxu0 }
 0x4d7   : > { %v3654_v41 = vpop.f32.mrf.mxu1 }
 0x4d8   : > { %v3660_v51 = vpop.f32.mrf.mxu0 }
 0x4d9   : > { %v2258_v22 = vpop.f32.mrf.mxu1 }
 0x4da   : > { %v2304_v52 = vpop.f32.mrf.mxu0 }
 0x4db   : > { %v3655_v53 = vpop.f32.mrf.mxu1 }
 0x4dc   : > { %v3661_v43 = vpop.f32.mrf.mxu0 }
 0x4dd   : > { %v2347_v4 = vpop.f32.mrf.mxu1 }
 0x4de   : > { %v2583_v54 = vcombine.low %v2255_v49, %v2347_v4  ;;  %v2584_v8 = vcombine.high %v2255_v49, %v2347_v4 }
 0x4df   : > { %v3666_v55 = vpop.f32.mrf.mxu1 }
 0x4e0   : > { %v2591_v15 = vrot.slane %v2583_v54, %v4253_v29  ;;  %v2598_v62 = vrot.slane %v2584_v8, %v4253_v29 }
 0x4e1   : > { %v2350_v56 = vpop.f32.mrf.mxu1 }
 0x4e2   : > { %v2393_v57 = vpop.f32.mrf.mxu0 }
 0x4e3   : > { %v2599_v17 = vcombine.low %v2301_v50, %v2393_v57  ;;  %v2600_v60 = vcombine.high %v2301_v50, %v2393_v57  ;;  %v3667_v16 = vpop.f32.mrf.mxu1 }
 0x4e4   : > { %v3672_v61 = vpop.f32.mrf.mxu0 }
 0x4e5   : > { %v2607_v39 = vrot.slane %v2599_v17, %v4253_v29  ;;  %v2614_v32 = vrot.slane %v2600_v60, %v4253_v29 }
 0x4e6   : > { %v2396_v13 = vpop.f32.mrf.mxu0 }
 0x4e7   : > { %v2615_v33 = vcombine.low %v2591_v15, %v2607_v39  ;;  %v2616_v24 = vcombine.high %v2591_v15, %v2607_v39  ;;  %v2631_v59 = vcombine.low %v2598_v62, %v2614_v32  ;;  %v2632_v63 = vcombine.high %v2598_v62, %v2614_v32 }
 0x4e8   : > { %v3673_v0 = vpop.f32.mrf.mxu0 }
 0x4e9   : > { %v2623_v19 = vrot.slane %v2615_v33, %v4264_v38  ;;  %v2630_v1 = vrot.slane %v2616_v24, %v4264_v38  ;;  %v2639_v20 = vrot.slane %v2631_v59, %v4264_v38  ;;  %v2646_v21 = vrot.slane %v2632_v63, %v4264_v38  ;;  %v3812_v0 = vld [vmem:[%s4169_s19 + $0x8] sm:$0xff]  }
 0x4ea   : > { %3699 = vmatpush3.bf16.msra.mxu1 %v3812_v0 }
 0x4eb   : > { %v2719_v6 = vcombine.low %v2623_v19, %v2630_v1  ;;  %v3514_v18 = vcombine.high %v2623_v19, %v2630_v1  ;;  %v2735_v44 = vcombine.low %v2639_v20, %v2646_v21  ;;  %v3515_v5 = vcombine.high %v2639_v20, %v2646_v21  ;;  %3700 = vmatprep.subr.bf16.mxu1 %v3988_v3 }
 0x4ed   : > { %v2726_v40 = vrot.slane %v2719_v6, %v4253_v29  ;;  %v2734_v2 = vrot.slane %v3514_v18, %v4253_v29  ;;  %v2742_v9 = vrot.slane %v2735_v44, %v4253_v29  ;;  %v2750_v42 = vrot.slane %v3515_v5, %v4253_v29 }
 0x4ef   : > { %v2752_v7 = vcombine.high %v2726_v40, %v2734_v2  ;;  %v2768_v10 = vcombine.high %v2742_v9, %v2750_v42  ;;  %v2751_v11 = vcombine.low %v2726_v40, %v2734_v2  ;;  %v2767_v14 = vcombine.low %v2742_v9, %v2750_v42  ;;  %v3813_v40 = vld [vmem:[%s4169_s19] sm:$0xff]   ;;  %s3998_s19 = smov 8  }
 0x4f0   : > { %3701 = vmatpush3.bf16.msra.mxu1 %v3813_v40 }
 0x4f1   : > { %v4581_v26 = vrot.slane %v2752_v7, %v4264_v38  ;;  %v4584_v27 = vrot.slane %v2768_v10, %v4264_v38  ;;  %v4587_v28 = vrot.slane %v2751_v11, %v4264_v38  ;;  %v4590_v30 = vrot.slane %v2767_v14, %v4264_v38  ;;  %3714 = vmatprep.subr.bf16.mxu1 %v3988_v3 }
 0x4f3   : > { %v2439_v31 = vpop.f32.mrf.mxu1  ;;  %v2485_v34 = vpop.f32.mrf.mxu0  ;;  %v2785_v35 = vcombine.low %v4581_v26, %v4584_v27  ;;  %v2783_v12 = vcombine.low %v4587_v28, %v4590_v30  ;;  %v2784_v23 = vcombine.high %v4587_v28, %v4590_v30  ;;  %v2786_v36 = vcombine.high %v4581_v26, %v4584_v27  ;;  %v3518_v28 = vld [vmem:[%s4767_s4] ss:$0 sm:$0xff] }
 0x4f5   : > { %v3678_v25 = vpop.f32.mrf.mxu1  ;;  %v3684_v58 = vpop.f32.mrf.mxu0 }
 0x4f7   : > { %v2442_v37 = vpop.f32.mrf.mxu1  ;;  %v2488_v45 = vpop.f32.mrf.mxu0 }
 0x4f9   : > { %v3679_v46 = vpop.f32.mrf.mxu1  ;;  %v3685_v47 = vpop.f32.mrf.mxu0 }
 0x51a   : > { %v2577_v48 = vpop.f32.mrf.mxu0 }
 0x51b   : > { %v2667_v50 = vcombine.low %v2485_v34, %v2577_v48  ;;  %v2668_v41 = vcombine.high %v2485_v34, %v2577_v48 }
 0x51c   : > { %v3696_v49 = vpop.f32.mrf.mxu0 }
 0x51d   : > { %v2675_v54 = vrot.slane %v2667_v50, %v4253_v29  ;;  %v2682_v8 = vrot.slane %v2668_v41, %v4253_v29 }
 0x51e   : > { %v2531_v51 = vpop.f32.mrf.mxu1  ;;  %v2580_v22 = vpop.f32.mrf.mxu0 }
 0x51f   : > { %v2651_v52 = vcombine.low %v2439_v31, %v2531_v51  ;;  %v2652_v53 = vcombine.high %v2439_v31, %v2531_v51 }
 0x520   : > { %v3690_v43 = vpop.f32.mrf.mxu1  ;;  %v3697_v4 = vpop.f32.mrf.mxu0 }
 0x521   : > { %v2659_v55 = vrot.slane %v2651_v52, %v4253_v29  ;;  %v2666_v56 = vrot.slane %v2652_v53, %v4253_v29  ;;  %v3864_v52 = vld [vmem:[#allocation7] sm:$0xff] }
 0x522   : > { %v2534_v57 = vpop.f32.mrf.mxu1 }
 0x523   : > { %v2683_v17 = vcombine.low %v2659_v55, %v2675_v54  ;;  %v2684_v60 = vcombine.high %v2659_v55, %v2675_v54  ;;  %v2699_v16 = vcombine.low %v2666_v56, %v2682_v8  ;;  %v2700_v61 = vcombine.high %v2666_v56, %v2682_v8  ;;  %v3865_v55 = vld [vmem:[#allocation7 + $0x8] sm:$0xff] }
 0x524   : > { %v3691_v15 = vpop.f32.mrf.mxu1 }
 0x525   : > { %v2691_v62 = vrot.slane %v2683_v17, %v4264_v38  ;;  %v2698_v39 = vrot.slane %v2684_v60, %v4264_v38  ;;  %v2707_v32 = vrot.slane %v2699_v16, %v4264_v38  ;;  %v2714_v13 = vrot.slane %v2700_v61, %v4264_v38 }
 0x527   : > { %v2787_v33 = vcombine.low %v2691_v62, %v2698_v39  ;;  %v3516_v24 = vcombine.high %v2691_v62, %v2698_v39  ;;  %v2803_v59 = vcombine.low %v2707_v32, %v2714_v13  ;;  %v3517_v63 = vcombine.high %v2707_v32, %v2714_v13 }
 0x529   : > { %v2794_v19 = vrot.slane %v2787_v33, %v4253_v29  ;;  %v2802_v1 = vrot.slane %v3516_v24, %v4253_v29  ;;  %v2810_v20 = vrot.slane %v2803_v59, %v4253_v29  ;;  %v2818_v21 = vrot.slane %v3517_v63, %v4253_v29  ;;  %v3814_v24 = vld [vmem:[%s4186_s27 + $0x8] sm:$0xff]   ;;  %v3815_v59 = vld [vmem:[%s4186_s27] sm:$0xff]   ;;  %s4768_s27 = scalar_lea.vmem %s4735_s6, %s4156_s16 }
 0x52a   : > { %3707 = vmatpush3.bf16.msra.mxu0 %v3814_v24 }
 0x52b   : > { %v2820_v6 = vcombine.high %v2794_v19, %v2802_v1  ;;  %v2836_v18 = vcombine.high %v2810_v20, %v2818_v21  ;;  %v2819_v44 = vcombine.low %v2794_v19, %v2802_v1  ;;  %v2835_v5 = vcombine.low %v2810_v20, %v2818_v21  ;;  %3708 = vmatprep.subr.bf16.mxu0 %v3988_v3 }
 0x52d   : > { %v2834_v2 = vrot.slane %v2820_v6, %v4264_v38  ;;  %v2850_v9 = vrot.slane %v2836_v18, %v4264_v38  ;;  %v2827_v42 = vrot.slane %v2819_v44, %v4264_v38  ;;  %v2843_v7 = vrot.slane %v2835_v5, %v4264_v38  ;;  %v3522_v44 = vld [vmem:[%s4768_s27] ss:$0 sm:$0xff] }
 0x52e   : > { %3709 = vmatpush3.bf16.msra.mxu0 %v3815_v59 }
 0x52f   : > { %v2853_v10 = vcombine.low %v2834_v2, %v2850_v9  ;;  %v2852_v11 = vcombine.high %v2827_v42, %v2843_v7  ;;  %v2851_v29 = vcombine.low %v2827_v42, %v2843_v7  ;;  %v2854_v34 = vcombine.high %v2834_v2, %v2850_v9  ;;  %v3523_v9 = vld [vmem:[%s4769_s20] ss:$0 sm:$0xff] }
 0x531   : > { %v3800_v14 = vpack.i.bf16 %v2853_v10, %v2785_v35  ;;  %v3795_v31 = vpack.i.bf16 %v2852_v11, %v2784_v23  ;;  %v3805_v25 = vpack.i.bf16 %v2854_v34, %v2786_v36  ;;  %v3819_v34 = vld [vmem:[%s4196_s0] sm:$0xff]  }
 0x533   : > { %3801 = vrot.lane.b32.xlu1 %v3800_v14, %s3997_s18  ;;  %3796 = vrot.lane.b32.xlu0 %v3795_v31, %s3998_s19  ;;  %v3817_v14 = vld [vmem:[%s4196_s0 + $0x10] sm:$0xff]   ;;  %v3818_v31 = vld [vmem:[%s4196_s0 + $0x8] sm:$0xff]  }
 0x537   : > { %3806 = vrot.lane.b32.xlu0 %v3805_v25, %s3999_s23  ;;  %v3524_v25 = vld [vmem:[%s730_s2] ss:$0 sm:$0xff] }
 0x5a5   : > { %v3802_v38 = vpop.permute.xlu1 %3801  ;;  %v3797_v58 = vpop.permute.xlu0 %3796 }
 0x5a6   : > { %v3799_v37 = vunpack.i.h.bf16 %v3797_v58  ;;  %v3798_v45 = vunpack.i.l.bf16 %v3797_v58  ;;  %v3804_v46 = vunpack.i.h.bf16 %v3802_v38  ;;  %v3803_v35 = vunpack.i.l.bf16 %v3802_v38 }
 0x5a8   : > { %v2879_v23 = vsel %vm1749_vm3, %v2783_v12, %v3798_v45  ;;  %v2880_v47 = vsel %vm1749_vm3, %v2851_v29, %v3799_v37  ;;  %v3816_v29 = vld [vmem:[%s4196_s0 + $0x18] sm:$0xff]  }
 0x5a9   : > { %v3807_v26 = vpop.permute.xlu0 %3806  ;;  %v2882_v48 = vsel %vm2881_vm5, %v2879_v23, %v3803_v35  ;;  %v2883_v49 = vsel %vm2881_vm5, %v2880_v47, %v3804_v46 }
 0x5aa   : > { %v3809_v27 = vunpack.i.h.bf16 %v3807_v26  ;;  %v3808_v36 = vunpack.i.l.bf16 %v3807_v26 }
 0x5ac   : > { %v2885_v50 = vsel %vm2884_vm6, %v2882_v48, %v3808_v36  ;;  %v2886_v41 = vsel %vm2884_vm6, %v2883_v49, %v3809_v27 }
 0x5ad   : > { %v2887_v51 = vpack.c.bf16 %v2886_v41, %v2885_v50 }
 0x5af   : > { %3703 = vmatmul.mubr.msk.bf16.vlgmr.msra.gmra.mxu1 %vm782_vm2, %v2887_v51 }
 0x5b0   : > { %3722 = vmatprep.mubr.msk.bf16.mxu1 %vm3989_vm1, %v3988_v3  ;;  %3715 = vmatpush3.bf16.msra.mxu1 %v3816_v29 }
 0x5b1   : > { %3716 = vmatprep.subr.bf16.mxu1 %v3988_v3 }
 0x5b4   : > { %3717 = vmatpush3.bf16.msra.mxu1 %v3817_v14 }
 0x5b5   : > { %3718 = vmatprep.subr.bf16.mxu1 %v3988_v3 }
 0x5b8   : > { %3719 = vmatpush3.bf16.msra.mxu1 %v3818_v31 }
 0x5b9   : > { %3720 = vmatprep.subr.bf16.mxu1 %v3988_v3 }
 0x5bc   : > { %3721 = vmatpush3.bf16.msra.mxu1 %v3819_v34 }
 0x66f   : > { %v2948_v30 = vpop.f32.mrf.mxu1 }
 0x670   : > { %v2949_v12 = vadd.f32 %v3518_v28, %v2948_v30 }
 0x671   : > { %v3704_v22 = vpop.f32.mrf.mxu1 }
 0x672   : > { %v2955_v53 = vadd.f32 %v3864_v52, %v2949_v12 }
 0x673   : > { %v2951_v43 = vpop.f32.mrf.mxu1 }
 0x674   : > { %v2952_v4 = vadd.f32 %v3518_v28, %v2951_v43  ;;  %v2959_v54 = vsel %vm782_vm2, %v2955_v53, 0.0  ;;  %v3528_v28 = vld [vmem:[%s738_s14] ss:$0 sm:$0xff] }
 0x675   : > { %2960 = vadd.xlane.f32.xlu1 %v2959_v54  ;;  %v3705_v8 = vpop.f32.mrf.mxu1 }
 0x676   : > { %v2956_v56 = vadd.f32 %v3865_v55, %v2952_v4 }
 0x678   : > { %v2962_v57 = vsel %vm782_vm2, %v2956_v56, 0.0 }
 0x679   : > { %2963 = vadd.xlane.f32.xlu0 %v2962_v57 }
 0x6fe   : > { %v2961_v17 = vpop.xlane.xlu1 %2960 }
 0x6ff   : > { %v2966_v60 = vmul.f32 0.03125, %v2961_v17 }
 0x701   : > { %v2968_v16 = vsub.f32 %v2955_v53, %v2966_v60 }
 0x702   : > { %v2964_v61 = vpop.xlane.xlu0 %2963 }
 0x703   : > { %v2967_v15 = vmul.f32 0.03125, %v2964_v61  ;;  %v2970_v62 = vmul.f32 %v2968_v16, %v2968_v16 }
 0x705   : > { %v2969_v39 = vsub.f32 %v2956_v56, %v2967_v15  ;;  %v2972_v32 = vsel %vm782_vm2, %v2970_v62, 0.0 }
 0x706   : > { %2973 = vadd.xlane.f32.xlu0 %v2972_v32 }
 0x707   : > { %v2971_v13 = vmul.f32 %v2969_v39, %v2969_v39 }
 0x709   : > { %v2975_v33 = vsel %vm782_vm2, %v2971_v13, 0.0 }
 0x70a   : > { %2976 = vadd.xlane.f32.xlu1 %v2975_v33 }
 0x78f   : > { %v2974_v63 = vpop.xlane.xlu0 %2973 }
 0x790   : > { %v2978_v0 = vmul.f32 0.03125, %v2974_v63 }
 0x792   : > { %v2980_v19 = vadd.f32 1e-05, %v2978_v0 }
 0x793   : > { %v2977_v1 = vpop.xlane.xlu1 %2976 }
 0x794   : > { %3852 = vrsqrt.f32 %v2980_v19  ;;  %v2979_v20 = vmul.f32 0.03125, %v2977_v1  ;;  %v3534_v1 = vld [vmem:[%s741_s25] ss:$0 sm:$0xff] }
 0x796   : > { %v2981_v21 = vadd.f32 1e-05, %v2979_v20 }
 0x798   : > { %3854 = vrsqrt.f32 %v2981_v21  ;;  %v3535_v21 = vld [vmem:[%s744_s15] ss:$0 sm:$0xff] }
 0x7a1   : > { %v3853_v6 = vpop.eup %3852 }
 0x7a2   : > { %v2984_v18 = vmul.f32 %v3853_v6, %v2968_v16 }
 0x7a4   : > { %v2992_v2 = vmul.f32 %v3522_v44, %v2984_v18 }
 0x7a5   : > { %v3855_v5 = vpop.eup %3854 }
 0x7a6   : > { %v2985_v40 = vmul.f32 %v3855_v5, %v2969_v39  ;;  %v3000_v7 = vadd.f32 %v3523_v9, %v2992_v2 }
 0x7a8   : > { %v2993_v42 = vmul.f32 %v3522_v44, %v2985_v40 }
 0x7aa   : > { %v3001_v10 = vadd.f32 %v3523_v9, %v2993_v42 }
 0x7ac   : > { %v3002_v11 = vpack.c.bf16 %v3001_v10, %v3000_v7 }
 0x7ae   : > { %3711 = vmatmul.mubr.msk.bf16.vlgmr.msra.gmra.mxu0 %vm782_vm2, %v3002_v11 }
 0x86e   : > { %v3063_v38 = vpop.f32.mrf.mxu0 }
 0x86f   : > { %v3064_v58 = vadd.f32 %v3524_v25, %v3063_v38 }
 0x870   : > { %v3712_v37 = vpop.f32.mrf.mxu0 }
 0x871   : > { %v3072_v45 = vmul.f32 0.70710677, %v3064_v58  ;;  %v3070_v36 = vmul.f32 0.5, %v3064_v58 }
 0x872   : > { %v3066_v46 = vpop.f32.mrf.mxu0 }
 0x873   : > { %3856 = verf.f32 %v3072_v45  ;;  %v3067_v35 = vadd.f32 %v3524_v25, %v3066_v46 }
 0x874   : > { %v3713_v23 = vpop.f32.mrf.mxu0 }
 0x875   : > { %v3073_v47 = vmul.f32 0.70710677, %v3067_v35  ;;  %v3071_v48 = vmul.f32 0.5, %v3067_v35 }
 0x877   : > { %3858 = verf.f32 %v3073_v47 }
 0x880   : > { %v3857_v26 = vpop.eup %3856 }
 0x881   : > { %v3076_v3 = vadd.f32 1.0, %v3857_v26 }
 0x883   : > { %v3078_v50 = vmul.f32 %v3076_v3, %v3070_v36 }
 0x884   : > { %v3859_v27 = vpop.eup %3858 }
 0x885   : > { %v3077_v49 = vadd.f32 1.0, %v3859_v27 }
 0x887   : > { %v3079_v41 = vmul.f32 %v3077_v49, %v3071_v48 }
 0x889   : > { %v3080_v51 = vpack.c.bf16 %v3079_v41, %v3078_v50 }
 0x88b   : > { %3723 = vmatmul.mubr.msk.bf16.vlgmr.msra.gmra.mxu1 %vm3120_vm7, %v3080_v51 }
 0x94b   : > { %v3158_v30 = vpop.f32.mrf.mxu1 }
 0x94c   : > { %v3159_v12 = vadd.f32 %v3528_v28, %v3158_v30 }
 0x94d   : > { %v3724_v22 = vpop.f32.mrf.mxu1 }
 0x94e   : > { %v3165_v52 = vadd.f32 %v3159_v12, %v3000_v7 }
 0x94f   : > { %v3161_v53 = vpop.f32.mrf.mxu1 }
 0x950   : > { %v3162_v43 = vadd.f32 %v3528_v28, %v3161_v53  ;;  %v3169_v4 = vsel %vm782_vm2, %v3165_v52, 0.0 }
 0x951   : > { %3170 = vadd.xlane.f32.xlu0 %v3169_v4  ;;  %v3725_v54 = vpop.f32.mrf.mxu1 }
 0x952   : > { %v3166_v8 = vadd.f32 %v3162_v43, %v3001_v10 }
 0x954   : > { %v3172_v55 = vsel %vm782_vm2, %v3166_v8, 0.0 }
 0x955   : > { %3173 = vadd.xlane.f32.xlu1 %v3172_v55 }
 0x9da   : > { %v3171_v56 = vpop.xlane.xlu0 %3170 }
 0x9db   : > { %v3175_v57 = vmul.f32 0.03125, %v3171_v56 }
 0x9dd   : > { %v3177_v17 = vsub.f32 %v3165_v52, %v3175_v57 }
 0x9de   : > { %v3174_v60 = vpop.xlane.xlu1 %3173 }
 0x9df   : > { %v3176_v16 = vmul.f32 0.03125, %v3174_v60  ;;  %v3179_v61 = vmul.f32 %v3177_v17, %v3177_v17 }
 0x9e1   : > { %v3178_v15 = vsub.f32 %v3166_v8, %v3176_v16  ;;  %v3181_v62 = vsel %vm782_vm2, %v3179_v61, 0.0 }
 0x9e2   : > { %3182 = vadd.xlane.f32.xlu0 %v3181_v62 }
 0x9e3   : > { %v3180_v39 = vmul.f32 %v3178_v15, %v3178_v15 }
 0x9e5   : > { %v3184_v32 = vsel %vm782_vm2, %v3180_v39, 0.0 }
 0x9e6   : > { %3185 = vadd.xlane.f32.xlu1 %v3184_v32 }
 0xa6b   : > { %v3183_v13 = vpop.xlane.xlu0 %3182 }
 0xa6c   : > { %v3187_v33 = vmul.f32 0.03125, %v3183_v13 }
 0xa6e   : > { %v3189_v24 = vadd.f32 1e-05, %v3187_v33 }
 0xa6f   : > { %v3186_v59 = vpop.xlane.xlu1 %3185 }
 0xa70   : > { %3860 = vrsqrt.f32 %v3189_v24  ;;  %v3188_v63 = vmul.f32 0.03125, %v3186_v59 }
 0xa72   : > { %v3190_v0 = vadd.f32 1e-05, %v3188_v63 }
 0xa74   : > { %3862 = vrsqrt.f32 %v3190_v0 }
 0xa7d   : > { %v3861_v19 = vpop.eup %3860 }
 0xa7e   : > { %v3193_v20 = vmul.f32 %v3861_v19, %v3177_v17 }
 0xa80   : > { %v3201_v6 = vmul.f32 %v3534_v1, %v3193_v20 }
 0xa81   : > { %v3863_v18 = vpop.eup %3862 }
 0xa82   : > { %v3209_v44 = vadd.f32 %v3535_v21, %v3201_v6  ;;  %v3194_v5 = vmul.f32 %v3863_v18, %v3178_v15  ;;  %3214 = sbr.rel (%p3536_p4) target bundleno = 2697 (0xa89), region = 100 }
 0xa84   : > { %v3202_v40 = vmul.f32 %v3534_v1, %v3194_v5 }
 0xa86   : > { %v3210_v2 = vadd.f32 %v3535_v21, %v3202_v40 }
 0xa87   : > { %3215 = vst.msk [vmem:[#allocation7] sm:$0xff] %vm782_vm2, %v3209_v44 }
 0xa88   : > { %3216 = vst.msk [vmem:[#allocation7 + $0x8] sm:$0xff] %vm782_vm2, %v3210_v2 }
 0xa89 PF: > { %p3537_p6 = scmp.ne.s32.totalorder %s3972_s21, 1 }
 0xa8a   : > { %s4770_s16 = sld [smem:[#allocation18_spill]] (!%p3537_p6) }
 0xa8b   : > { %3220 = sbr.rel (%p3537_p6) target bundleno = 3017 (0xbc9), region = 104  ;;  %s4771_s4 = sld [smem:[#allocation19_spill]] (!%p3537_p6) }
 0xa90   : > { %v3223_v9 = vsel %vm782_vm2, %v3209_v44, 0.0  ;;  %v3226_v42 = vsel %vm782_vm2, %v3210_v2, 0.0  ;;  %v3538_v3 = vld [vmem:[%s4770_s16] ss:$0 sm:$0xff] }
 0xa91   : > { %3224 = vadd.xlane.f32.xlu0 %v3223_v9  ;;  %v3539_v36 = vld [vmem:[%s4771_s4] ss:$0 sm:$0xff] }
 0xa95   : > { %3227 = vadd.xlane.f32.xlu0 %v3226_v42 }
 0xb1a   : > { %v3225_v7 = vpop.xlane.xlu0 %3224 }
 0xb1b   : > { %v3229_v10 = vmul.f32 0.03125, %v3225_v7 }
 0xb1d   : > { %v3231_v11 = vsub.f32 %v3209_v44, %v3229_v10 }
 0xb1e   : > { %v3228_v29 = vpop.xlane.xlu0 %3227 }
 0xb1f   : > { %v3230_v14 = vmul.f32 0.03125, %v3228_v29  ;;  %v3233_v31 = vmul.f32 %v3231_v11, %v3231_v11 }
 0xb21   : > { %v3232_v34 = vsub.f32 %v3210_v2, %v3230_v14  ;;  %v3235_v25 = vsel %vm782_vm2, %v3233_v31, 0.0 }
 0xb22   : > { %3236 = vadd.xlane.f32.xlu1 %v3235_v25 }
 0xb23   : > { %v3234_v38 = vmul.f32 %v3232_v34, %v3232_v34 }
 0xb25   : > { %v3238_v58 = vsel %vm782_vm2, %v3234_v38, 0.0 }
 0xb26   : > { %3239 = vadd.xlane.f32.xlu1 %v3238_v58 }
 0xbab   : > { %v3237_v37 = vpop.xlane.xlu1 %3236 }
 0xbac   : > { %v3241_v45 = vmul.f32 0.03125, %v3237_v37 }
 0xbae   : > { %v3243_v46 = vadd.f32 1e-05, %v3241_v45 }
 0xbaf   : > { %v3240_v35 = vpop.xlane.xlu1 %3239 }
 0xbb0   : > { %3866 = vrsqrt.f32 %v3243_v46  ;;  %v3242_v23 = vmul.f32 0.03125, %v3240_v35 }
 0xbb2   : > { %v3244_v47 = vadd.f32 1e-05, %v3242_v23 }
 0xbb4   : > { %3868 = vrsqrt.f32 %v3244_v47 }
 0xbbd   : > { %v3867_v26 = vpop.eup %3866 }
 0xbbe   : > { %v3247_v27 = vmul.f32 %v3867_v26, %v3231_v11 }
 0xbc0   : > { %v3255_v48 = vmul.f32 %v3538_v3, %v3247_v27 }
 0xbc1   : > { %v3869_v49 = vpop.eup %3868 }
 0xbc2   : > { %v3263_v50 = vadd.f32 %v3539_v36, %v3255_v48  ;;  %v3248_v41 = vmul.f32 %v3869_v49, %v3232_v34 }
 0xbc4   : > { %3265 = vst.msk [vmem:[#allocation7] sm:$0xff] %vm782_vm2, %v3263_v50  ;;  %v3256_v51 = vmul.f32 %v3538_v3, %v3248_v41 }
 0xbc6   : > { %v3264_v28 = vadd.f32 %v3539_v36, %v3256_v51 }
 0xbc8   : > { %3266 = vst.msk [vmem:[#allocation7 + $0x8] sm:$0xff] %vm782_vm2, %v3264_v28 }
 0xbc9 PF: > { %s4772_s29 = sld [smem:[#allocation12_spill]]  ;;  %s4000_s30 = smov [#allocation7]  }
 0xbca   : > { %s3276_s17 = sshll.u32 %s4000_s30, 4  ;;  %s3277_s17 = int_to_ptr.vmem [resolvable:$true] %s3276_s17 }
 0xbcb   : > { %s3922_s20 = scalar_lea.vmem %s3277_s17, 256  ;;  %p3929_p2 = scmp.lt.s32.totalorder %s3277_s17, %s3277_s17 }
 0xbcc   : > { %p3923_p13 = scmp.ne.s32.totalorder %s3277_s17, %s3922_s20  ;;  %p3930_p5 = scmp.lt.s32.totalorder %s3922_s20, %s3922_s20 }
 0xbce   : > { %p3931_p8 = por %p3930_p5, %p3929_p2 }
 0xbcf   : > { %s4773_s24 = sadd.s32 4294967295, %s4772_s29  }
 0xbd0   : > { %p4704_p12 = scmp.eq.s32.totalorder %s4773_s24, 1 }
 0xbd2   : > { %p3924_p0 = pnand %p3923_p13, %p4704_p12 }
 0xbd4   : > { %p3925_p1 = pneg %p3924_p0 }
 0xbd6   : > { %p3932_p9 = pnand %p3931_p8, %p3925_p1 }
 0xbd8   : > { %3935 = shalt.err (!%p3932_p9)
}
 0xbd9   : > { %s4001_s28 = smov 128   ;;  %s4775_s0 = sld [smem:[#allocation20_spill]] }
 0xbdf   : > { %3735 = dma.vmem_to_hbm [thread:$0]  (%p4704_p12), %s3277_s17, 256, %s4775_s0, [#allocation4], %s4001_s28, %s4001_s28, %s3998_s19  }
 0xbe0   : > { %3967 = dma.done.wait (%p4704_p12), [#allocation4], 256  }
 0xbe1   : > { %3969 = vsyncadd (%p4704_p12), [#allocation4], 4294967040 }
 0xbe2 PF: > { %s4776_s14 = sld [smem:[#allocation12_spill]] }
 0xbe3   : > { %s4777_s21 = sld [smem:[#allocation11_spill]] }
 0xbe4   : > { %s4778_s22 = sld [smem:[#allocation13_spill]] }
 0xbe8   : > { %s29_s23 = sadd.s32 1, %s4776_s14  }
 0xbe9   : > { %p26_p11 = scmp.ge.s32.totalorder %s29_s23, 4  }
 0xbeb   :  { %28 = sbr.rel (!%p26_p11) target bundleno = 12 (0xc), region = 168 }
 0xbf0   :  { %3292 = vsyncpa [#allocation3], 1 }
 0xbf1   :  { %3294 = vsyncpa [#allocation3 + $0x1], 1 }
 0xbf2   :  { %3295 = vsyncpa [#allocation6], 1 }
 0xbf3   :  { %3296 = vsyncpa [#allocation4], 1 }
 0xbf4   :  { %3298 = vsyncpa [#allocation4 + $0x1], 1 }

</bundles_post_ra>
